<compile_context>
chip_gen: v7x
topology: tpu7x:2x2x1
jax: 0.10.0
libtpu: 0.0.40
codegen_flags: <defaults>
</compile_context>

<pallas_src>
import functools

import jax
import jax.numpy as jnp
import numpy as np
from jax.experimental import pallas as pl
from jax.experimental.pallas import tpu as pltpu


def _encoder_kernel(x_ref, w1_ref, w234_ref, scale_ref, bias_ref, o_ref, pool_scr,
                    *, tile_n, length, channels):
    # x_ref:     (tile_n*L, 1)    TILE_N samples, batch-flattened, Cin = 1
    # w1_ref:    (3, C)           layer-1 conv taps
    # w234_ref:  (3, 3C, C)       layers 2-4 tap-packed conv weights
    # scale_ref: (4, C)           folded BN(eval) scale per layer
    # bias_ref:  (4, C)           folded conv-bias + BN(eval) bias per layer
    # o_ref:     (tile_n*L//16, C) final activation, channels-last, rows = (n, l)
    # pool_scr:  (tile_n*L, C)    scratch for the single stride-2 max-pool read
    C = channels
    m0 = tile_n * length

    def local_pos(shape, seg):
        # Per-sample position l in [0, seg) for batch-flattened rows (t*seg + l).
        return jax.lax.broadcasted_iota(jnp.int32, shape, 0) % seg

    def shifted_taps(a, seg):
        # a: (tile_n*seg, C). Returns (a[l-1], a[l+1]) per row with zero padding at
        # every per-sample segment boundary (also kills the roll wrap-around rows).
        rows = a.shape[0]
        pos = local_pos(a.shape, seg)
        down = jnp.where(pos == 0, 0.0, pltpu.roll(a, shift=1, axis=0))          # a[l-1]
        up = jnp.where(pos == seg - 1, 0.0, pltpu.roll(a, shift=rows - 1, axis=0))  # a[l+1]
        return down, up

    def bn_relu_pool(y, layer):
        # y: (M, C) conv output (no bias).  Folded eval-BN + ReLU + MaxPool1d(2):
        # pairwise max in vregs, one scratch store, one stride-2 sublane read.
        rows = y.shape[0]
        s = scale_ref[pl.ds(layer, 1), :]                      # (1, C) sublane-broadcast
        b = bias_ref[pl.ds(layer, 1), :]                       # (1, C)
        y = jnp.maximum(y * s + b, 0.0)
        m = jnp.maximum(y, pltpu.roll(y, shift=rows - 1, axis=0))   # m[i] = max(y[i], y[i+1])
        pool_scr[pl.ds(0, rows), :] = m
        return pool_scr[pl.ds(0, rows // 2, 2), :]             # even rows -> (rows//2, C)

    # ---- layer 1 (Cin = 1): one lane-broadcast of x, pure-VPU taps ----
    xb = jnp.broadcast_to(x_ref[...], (m0, C))                 # (M0, 1) -> (M0, C), once
    xd, xu = shifted_taps(xb, length)
    y = (xd * w1_ref[pl.ds(0, 1), :]
         + xb * w1_ref[pl.ds(1, 1), :]
         + xu * w1_ref[pl.ds(2, 1), :])
    a = bn_relu_pool(y, 0)                                     # (M0//2, C)

    # ---- layers 2-4: one tap-packed K=3C MXU dot per layer ----
    seg = length // 2
    for i in range(3):
        down, up = shifted_taps(a, seg)
        packed = jnp.concatenate([down, a, up], axis=1)        # (M, 3C)
        y = jnp.dot(packed, w234_ref[i], preferred_element_type=jnp.float32)
        a = bn_relu_pool(y, i + 1)
        seg //= 2

    o_ref[...] = a                                             # (tile_n * L//16, C)


def encoder_flatten_forward(x_ncl, params, *, tile_n=None):
    """x_ncl: (N, 1, L) PyTorch-style NCL input.
    params: list of 4 tuples (w (3, cin, cout), scale (C,), bias (C,)) with eval-BN folded."""
    N, cin, L = x_ncl.shape
    assert cin == 1 and L % 16 == 0, (cin, L)
    C = params[0][0].shape[-1]
    if tile_n is None:
        tile_n = 1
        for cand in (16, 8, 4, 2):
            if N % cand == 0:
                tile_n = cand
                break
    assert N % tile_n == 0, (N, tile_n)
    grid_n = N // tile_n
    lf = L // 16

    x2 = x_ncl.reshape(N * L, 1)                               # contiguous -> free reshape
    w1 = params[0][0].reshape(3, C)                            # (3, 1, C) -> (3, C)
    # Pack layers 2-4 taps for a single K=3C dot: row (k*C + cin) <-> tap k (x[l-1+k]),
    # in-channel cin — matches concat([a[l-1], a, a[l+1]], axis=1) column order in-kernel.
    w234 = jnp.stack([p[0].reshape(3 * C, C) for p in params[1:]])   # (3, 3C, C)
    scales = jnp.stack([p[1] for p in params])                 # (4, C)
    biases = jnp.stack([p[2] for p in params])                 # (4, C)

    kernel = functools.partial(_encoder_kernel, tile_n=tile_n, length=L, channels=C)
    out = pl.pallas_call(
        kernel,
        out_shape=jax.ShapeDtypeStruct((N * lf, C), jnp.float32),
        grid=(grid_n,),
        in_specs=[
            pl.BlockSpec((tile_n * L, 1), lambda g: (g, 0)),
            pl.BlockSpec((3, C), lambda g: (0, 0)),
            pl.BlockSpec((3, 3 * C, C), lambda g: (0, 0, 0)),
            pl.BlockSpec((4, C), lambda g: (0, 0)),
            pl.BlockSpec((4, C), lambda g: (0, 0)),
        ],
        out_specs=pl.BlockSpec((tile_n * lf, C), lambda g: (g, 0)),
        scratch_shapes=[pltpu.VMEM((tile_n * L, C), jnp.float32)],
        compiler_params=pltpu.CompilerParams(dimension_semantics=("parallel",)),
    )(x2, w1, w234, scales, biases)                            # (N*lf, C), rows = (n, l)

    # `Flatten` == x.view(N, -1) on the NCL activation (N, C, lf): channel-major order.
    # This transpose + collapse is one tiny fused XLA op under jit (see header TODO).
    return jnp.transpose(out.reshape(N, lf, C), (0, 2, 1)).reshape(N, C * lf)


def encoder_flatten_reference(x_ncl, params):
    """Pure-JAX reference: 4x [Conv1d(k=3,pad=1,no bias) + folded eval-BN + ReLU +
    MaxPool1d(2)] followed by Flatten (x.view(N, -1))."""
    a = x_ncl
    for w, scale, bias in params:                              # w: (3, cin, cout)
        N, _, L = a.shape
        ap = jnp.pad(a, ((0, 0), (0, 0), (1, 1)))
        taps = jnp.stack([ap[:, :, k:k + L] for k in range(3)], axis=0)   # (3, N, cin, L)
        y = jnp.einsum("knil,kid->ndl", taps, w, precision=jax.lax.Precision.HIGHEST)
        y = jnp.maximum(y * scale[None, :, None] + bias[None, :, None], 0.0)
        a = jnp.max(y.reshape(N, -1, L // 2, 2), axis=-1)      # MaxPool1d(2)
    return a.reshape(a.shape[0], -1)                           # Flatten


def init_block_params(key, cin, cout, eps=1e-5):
    """Deterministic synthetic parameters for Conv1d + BatchNorm1d (eval mode)."""
    kw, kb, kg, kbeta, km, kv = jax.random.split(key, 6)
    fan_in = cin * 3
    bound = 1.0 / (fan_in ** 0.5)
    w = jax.random.uniform(kw, (3, cin, cout), jnp.float32, -bound, bound)
    b_conv = jax.random.uniform(kb, (cout,), jnp.float32, -bound, bound)
    gamma = 1.0 + 0.1 * jax.random.normal(kg, (cout,), jnp.float32)
    beta = 0.1 * jax.random.normal(kbeta, (cout,), jnp.float32)
    run_mean = 0.1 * jax.random.normal(km, (cout,), jnp.float32)
    run_var = jax.random.uniform(kv, (cout,), jnp.float32, 0.5, 1.5)
    scale = gamma / jnp.sqrt(run_var + eps)
    bias = (b_conv - run_mean) * scale + beta
    return w, scale, bias


if __name__ == "__main__":
    key = jax.random.PRNGKey(0)
    kx, k1, k2, k3, k4 = jax.random.split(key, 5)
    N, L, C = 4, 128, 64
    x = jax.random.normal(kx, (N, 1, L), jnp.float32)          # PyTorch-style NCL input
    params = [
        init_block_params(k1, 1, C),
        init_block_params(k2, C, C),
        init_block_params(k3, C, C),
        init_block_params(k4, C, C),
    ]
    # tile_n=2 -> grid=(2,): two batch-folded steps so both v7x TensorCores stay busy.
    fwd = jax.jit(lambda xx: encoder_flatten_forward(xx, params, tile_n=2))
    out = jax.block_until_ready(fwd(x))
    assert out.shape == (N, C * (L // 16)), out.shape
    assert jnp.all(jnp.isfinite(out))
    ref = encoder_flatten_reference(x, params)
    np.testing.assert_allclose(np.asarray(out), np.asarray(ref), rtol=2e-3, atol=2e-3)
    print("KERNEL_OK")
</pallas_src>

<mosaic_0001>
module attributes {stable_mosaic.version = 11 : i64} {
  func.func @_encoder_kernel(%arg0: i32, %arg1: memref<256x1xf32, #tpu.memory_space<vmem>>, %arg2: memref<3x64xf32, #tpu.memory_space<vmem>>, %arg3: memref<3x192x64xf32, #tpu.memory_space<vmem>>, %arg4: memref<4x64xf32, #tpu.memory_space<vmem>>, %arg5: memref<4x64xf32, #tpu.memory_space<vmem>>, %arg6: memref<16x64xf32, #tpu.memory_space<vmem>>, %arg7: memref<256x64xf32, #tpu.memory_space<vmem>>) attributes {dimension_semantics = [#tpu.dimension_semantics<parallel>], iteration_bounds = array<i64: 2>, scalar_prefetch = 0 : i64, scratch_operands = 1 : i64, tpu.core_type = #tpu.core_type<tc>, window_params = [{transform_indices = @transform_0, window_bounds = array<i64: 256, 1>}, {pipeline_mode = #tpu.pipeline_mode<synchronous>, transform_indices = @transform_1, window_bounds = array<i64: 3, 64>}, {pipeline_mode = #tpu.pipeline_mode<synchronous>, transform_indices = @transform_2, window_bounds = array<i64: 3, 192, 64>}, {pipeline_mode = #tpu.pipeline_mode<synchronous>, transform_indices = @transform_3, window_bounds = array<i64: 4, 64>}, {pipeline_mode = #tpu.pipeline_mode<synchronous>, transform_indices = @transform_4, window_bounds = array<i64: 4, 64>}, {transform_indices = @transform_5, window_bounds = array<i64: 16, 64>}]} {
    %c0 = arith.constant 0 : index
    %c0_0 = arith.constant 0 : index
    %0 = vector.load %arg1[%c0, %c0_0] : memref<256x1xf32, #tpu.memory_space<vmem>>, vector<256x1xf32>
    %1 = vector.shape_cast %0 : vector<256x1xf32> to vector<256x1xf32>
    %2 = vector.broadcast %1 : vector<256x1xf32> to vector<256x64xf32>
    %3 = tpu.iota {dimensions = array<i32: 0>} : vector<256x64xi32>
    %c128_i32 = arith.constant 128 : i32
    %c0_i32 = arith.constant 0 : i32
    %4 = arith.cmpi eq, %c128_i32, %c0_i32 : i32
    %c1_i32 = arith.constant 1 : i32
    %5 = arith.select %4, %c1_i32, %c128_i32 : i32
    %6 = vector.broadcast %5 : i32 to vector<256x64xi32>
    %7 = arith.remsi %3, %6 : vector<256x64xi32>
    %c0_i32_1 = arith.constant 0 : i32
    %8 = vector.broadcast %c0_i32_1 : i32 to vector<256x64xi32>
    %9 = arith.cmpi ne, %7, %8 : vector<256x64xi32>
    %c0_i32_2 = arith.constant 0 : i32
    %10 = vector.broadcast %c0_i32_2 : i32 to vector<256x64xi32>
    %11 = arith.cmpi slt, %7, %10 : vector<256x64xi32>
    %c0_i32_3 = arith.constant 0 : i32
    %12 = arith.cmpi slt, %5, %c0_i32_3 : i32
    %13 = vector.broadcast %12 : i1 to vector<256x64xi1>
    %14 = vector.broadcast %13 : vector<256x64xi1> to vector<256x64xi1>
    %15 = arith.xori %11, %14 : vector<256x64xi1>
    %16 = arith.andi %15, %9 : vector<256x64xi1>
    %17 = vector.broadcast %5 : i32 to vector<256x64xi32>
    %18 = arith.addi %7, %17 : vector<256x64xi32>
    %19 = arith.select %16, %18, %7 : vector<256x64xi1>, vector<256x64xi32>
    %c0_i32_4 = arith.constant 0 : i32
    %20 = vector.broadcast %c0_i32_4 : i32 to vector<256x64xi32>
    %21 = arith.cmpi eq, %19, %20 : vector<256x64xi32>
    %c1_i32_5 = arith.constant 1 : i32
    %22 = tpu.dynamic_rotate %2 by %c1_i32_5 dim 0 : vector<256x64xf32>, i32 -> vector<256x64xf32>
    %cst = arith.constant 0.000000e+00 : f32
    %23 = vector.broadcast %cst : f32 to vector<256x64xf32>
    %24 = arith.select %21, %23, %22 : vector<256x64xi1>, vector<256x64xf32>
    %c127_i32 = arith.constant 127 : i32
    %25 = vector.broadcast %c127_i32 : i32 to vector<256x64xi32>
    %26 = arith.cmpi eq, %19, %25 : vector<256x64xi32>
    %c255_i32 = arith.constant 255 : i32
    %27 = tpu.dynamic_rotate %2 by %c255_i32 dim 0 : vector<256x64xf32>, i32 -> vector<256x64xf32>
    %cst_6 = arith.constant 0.000000e+00 : f32
    %28 = vector.broadcast %cst_6 : f32 to vector<256x64xf32>
    %29 = arith.select %26, %28, %27 : vector<256x64xi1>, vector<256x64xf32>
    %c0_7 = arith.constant 0 : index
    %c0_8 = arith.constant 0 : index
    %30 = vector.load %arg2[%c0_7, %c0_8] : memref<3x64xf32, #tpu.memory_space<vmem>>, vector<1x64xf32>
    %31 = vector.broadcast %30 : vector<1x64xf32> to vector<256x64xf32>
    %32 = arith.mulf %24, %31 : vector<256x64xf32>
    %c1 = arith.constant 1 : index
    %c0_9 = arith.constant 0 : index
    %33 = vector.load %arg2[%c1, %c0_9] : memref<3x64xf32, #tpu.memory_space<vmem>>, vector<1x64xf32>
    %34 = vector.broadcast %33 : vector<1x64xf32> to vector<256x64xf32>
    %35 = arith.mulf %2, %34 : vector<256x64xf32>
    %36 = arith.addf %32, %35 : vector<256x64xf32>
    %c2 = arith.constant 2 : index
    %c0_10 = arith.constant 0 : index
    %37 = vector.load %arg2[%c2, %c0_10] : memref<3x64xf32, #tpu.memory_space<vmem>>, vector<1x64xf32>
    %38 = vector.broadcast %37 : vector<1x64xf32> to vector<256x64xf32>
    %39 = arith.mulf %29, %38 : vector<256x64xf32>
    %40 = arith.addf %36, %39 : vector<256x64xf32>
    %c0_11 = arith.constant 0 : index
    %c0_12 = arith.constant 0 : index
    %41 = vector.load %arg4[%c0_11, %c0_12] : memref<4x64xf32, #tpu.memory_space<vmem>>, vector<1x64xf32>
    %c0_13 = arith.constant 0 : index
    %c0_14 = arith.constant 0 : index
    %42 = vector.load %arg5[%c0_13, %c0_14] : memref<4x64xf32, #tpu.memory_space<vmem>>, vector<1x64xf32>
    %43 = vector.broadcast %41 : vector<1x64xf32> to vector<256x64xf32>
    %44 = arith.mulf %40, %43 : vector<256x64xf32>
    %45 = vector.broadcast %42 : vector<1x64xf32> to vector<256x64xf32>
    %46 = arith.addf %44, %45 : vector<256x64xf32>
    %cst_15 = arith.constant 0.000000e+00 : f32
    %47 = vector.broadcast %cst_15 : f32 to vector<256x64xf32>
    %48 = arith.maximumf %46, %47 : vector<256x64xf32>
    %c255_i32_16 = arith.constant 255 : i32
    %49 = tpu.dynamic_rotate %48 by %c255_i32_16 dim 0 : vector<256x64xf32>, i32 -> vector<256x64xf32>
    %50 = arith.maximumf %48, %49 : vector<256x64xf32>
    %c0_17 = arith.constant 0 : index
    %c0_18 = arith.constant 0 : index
    %51 = vector.load %arg7[%c0_17, %c0_18] : memref<256x64xf32, #tpu.memory_space<vmem>>, vector<256x64xf32>
    tpu.vector_store %arg7[%c0_17, %c0_18], %50 {strides = array<i32>} : memref<256x64xf32, #tpu.memory_space<vmem>>, vector<256x64xf32>,
    %c0_19 = arith.constant 0 : index
    %c0_20 = arith.constant 0 : index
    %52 = tpu.strided_load %arg7[%c0_19, %c0_20] {strides = array<i32: 2, 1>} : memref<256x64xf32, #tpu.memory_space<vmem>>, vector<128x64xf32>
    %53 = tpu.iota {dimensions = array<i32: 0>} : vector<128x64xi32>
    %c64_i32 = arith.constant 64 : i32
    %c0_i32_21 = arith.constant 0 : i32
    %54 = arith.cmpi eq, %c64_i32, %c0_i32_21 : i32
    %c1_i32_22 = arith.constant 1 : i32
    %55 = arith.select %54, %c1_i32_22, %c64_i32 : i32
    %56 = vector.broadcast %55 : i32 to vector<128x64xi32>
    %57 = arith.remsi %53, %56 : vector<128x64xi32>
    %c0_i32_23 = arith.constant 0 : i32
    %58 = vector.broadcast %c0_i32_23 : i32 to vector<128x64xi32>
    %59 = arith.cmpi ne, %57, %58 : vector<128x64xi32>
    %c0_i32_24 = arith.constant 0 : i32
    %60 = vector.broadcast %c0_i32_24 : i32 to vector<128x64xi32>
    %61 = arith.cmpi slt, %57, %60 : vector<128x64xi32>
    %c0_i32_25 = arith.constant 0 : i32
    %62 = arith.cmpi slt, %55, %c0_i32_25 : i32
    %63 = vector.broadcast %62 : i1 to vector<128x64xi1>
    %64 = vector.broadcast %63 : vector<128x64xi1> to vector<128x64xi1>
    %65 = arith.xori %61, %64 : vector<128x64xi1>
    %66 = arith.andi %65, %59 : vector<128x64xi1>
    %67 = vector.broadcast %55 : i32 to vector<128x64xi32>
    %68 = arith.addi %57, %67 : vector<128x64xi32>
    %69 = arith.select %66, %68, %57 : vector<128x64xi1>, vector<128x64xi32>
    %c0_i32_26 = arith.constant 0 : i32
    %70 = vector.broadcast %c0_i32_26 : i32 to vector<128x64xi32>
    %71 = arith.cmpi eq, %69, %70 : vector<128x64xi32>
    %c1_i32_27 = arith.constant 1 : i32
    %72 = tpu.dynamic_rotate %52 by %c1_i32_27 dim 0 : vector<128x64xf32>, i32 -> vector<128x64xf32>
    %cst_28 = arith.constant 0.000000e+00 : f32
    %73 = vector.broadcast %cst_28 : f32 to vector<128x64xf32>
    %74 = arith.select %71, %73, %72 : vector<128x64xi1>, vector<128x64xf32>
    %c63_i32 = arith.constant 63 : i32
    %75 = vector.broadcast %c63_i32 : i32 to vector<128x64xi32>
    %76 = arith.cmpi eq, %69, %75 : vector<128x64xi32>
    %c127_i32_29 = arith.constant 127 : i32
    %77 = tpu.dynamic_rotate %52 by %c127_i32_29 dim 0 : vector<128x64xf32>, i32 -> vector<128x64xf32>
    %cst_30 = arith.constant 0.000000e+00 : f32
    %78 = vector.broadcast %cst_30 : f32 to vector<128x64xf32>
    %79 = arith.select %76, %78, %77 : vector<128x64xi1>, vector<128x64xf32>
    %80 = tpu.concatenate %74, %52, %79 in 1 : vector<128x64xf32>, vector<128x64xf32>, vector<128x64xf32> -> vector<128x192xf32>
    %c0_31 = arith.constant 0 : index
    %c0_32 = arith.constant 0 : index
    %c0_33 = arith.constant 0 : index
    %81 = vector.load %arg3[%c0_31, %c0_32, %c0_33] : memref<3x192x64xf32, #tpu.memory_space<vmem>>, vector<1x192x64xf32>
    %82 = vector.shape_cast %81 : vector<1x192x64xf32> to vector<192x64xf32>
    %cst_34 = arith.constant dense<0.000000e+00> : vector<128x64xf32>
    %83 = tpu.matmul %80, %82, %cst_34 {dimension_numbers = #tpu.dot_dimension_numbers<[1], [0], [0], [1], [0, 0, 1, 1], [], []>} : vector<128x192xf32>, vector<192x64xf32>, vector<128x64xf32> -> vector<128x64xf32>
    %c1_35 = arith.constant 1 : index
    %c0_36 = arith.constant 0 : index
    %84 = vector.load %arg4[%c1_35, %c0_36] : memref<4x64xf32, #tpu.memory_space<vmem>>, vector<1x64xf32>
    %c1_37 = arith.constant 1 : index
    %c0_38 = arith.constant 0 : index
    %85 = vector.load %arg5[%c1_37, %c0_38] : memref<4x64xf32, #tpu.memory_space<vmem>>, vector<1x64xf32>
    %86 = vector.broadcast %84 : vector<1x64xf32> to vector<128x64xf32>
    %87 = arith.mulf %83, %86 : vector<128x64xf32>
    %88 = vector.broadcast %85 : vector<1x64xf32> to vector<128x64xf32>
    %89 = arith.addf %87, %88 : vector<128x64xf32>
    %cst_39 = arith.constant 0.000000e+00 : f32
    %90 = vector.broadcast %cst_39 : f32 to vector<128x64xf32>
    %91 = arith.maximumf %89, %90 : vector<128x64xf32>
    %c127_i32_40 = arith.constant 127 : i32
    %92 = tpu.dynamic_rotate %91 by %c127_i32_40 dim 0 : vector<128x64xf32>, i32 -> vector<128x64xf32>
    %93 = arith.maximumf %91, %92 : vector<128x64xf32>
    %c0_41 = arith.constant 0 : index
    %c0_42 = arith.constant 0 : index
    %94 = vector.load %arg7[%c0_41, %c0_42] : memref<256x64xf32, #tpu.memory_space<vmem>>, vector<128x64xf32>
    tpu.vector_store %arg7[%c0_41, %c0_42], %93 {strides = array<i32>} : memref<256x64xf32, #tpu.memory_space<vmem>>, vector<128x64xf32>,
    %c0_43 = arith.constant 0 : index
    %c0_44 = arith.constant 0 : index
    %95 = tpu.strided_load %arg7[%c0_43, %c0_44] {strides = array<i32: 2, 1>} : memref<256x64xf32, #tpu.memory_space<vmem>>, vector<64x64xf32>
    %96 = tpu.iota {dimensions = array<i32: 0>} : vector<64x64xi32>
    %c32_i32 = arith.constant 32 : i32
    %c0_i32_45 = arith.constant 0 : i32
    %97 = arith.cmpi eq, %c32_i32, %c0_i32_45 : i32
    %c1_i32_46 = arith.constant 1 : i32
    %98 = arith.select %97, %c1_i32_46, %c32_i32 : i32
    %99 = vector.broadcast %98 : i32 to vector<64x64xi32>
    %100 = arith.remsi %96, %99 : vector<64x64xi32>
    %c0_i32_47 = arith.constant 0 : i32
    %101 = vector.broadcast %c0_i32_47 : i32 to vector<64x64xi32>
    %102 = arith.cmpi ne, %100, %101 : vector<64x64xi32>
    %c0_i32_48 = arith.constant 0 : i32
    %103 = vector.broadcast %c0_i32_48 : i32 to vector<64x64xi32>
    %104 = arith.cmpi slt, %100, %103 : vector<64x64xi32>
    %c0_i32_49 = arith.constant 0 : i32
    %105 = arith.cmpi slt, %98, %c0_i32_49 : i32
    %106 = vector.broadcast %105 : i1 to vector<64x64xi1>
    %107 = vector.broadcast %106 : vector<64x64xi1> to vector<64x64xi1>
    %108 = arith.xori %104, %107 : vector<64x64xi1>
    %109 = arith.andi %108, %102 : vector<64x64xi1>
    %110 = vector.broadcast %98 : i32 to vector<64x64xi32>
    %111 = arith.addi %100, %110 : vector<64x64xi32>
    %112 = arith.select %109, %111, %100 : vector<64x64xi1>, vector<64x64xi32>
    %c0_i32_50 = arith.constant 0 : i32
    %113 = vector.broadcast %c0_i32_50 : i32 to vector<64x64xi32>
    %114 = arith.cmpi eq, %112, %113 : vector<64x64xi32>
    %c1_i32_51 = arith.constant 1 : i32
    %115 = tpu.dynamic_rotate %95 by %c1_i32_51 dim 0 : vector<64x64xf32>, i32 -> vector<64x64xf32>
    %cst_52 = arith.constant 0.000000e+00 : f32
    %116 = vector.broadcast %cst_52 : f32 to vector<64x64xf32>
    %117 = arith.select %114, %116, %115 : vector<64x64xi1>, vector<64x64xf32>
    %c31_i32 = arith.constant 31 : i32
    %118 = vector.broadcast %c31_i32 : i32 to vector<64x64xi32>
    %119 = arith.cmpi eq, %112, %118 : vector<64x64xi32>
    %c63_i32_53 = arith.constant 63 : i32
    %120 = tpu.dynamic_rotate %95 by %c63_i32_53 dim 0 : vector<64x64xf32>, i32 -> vector<64x64xf32>
    %cst_54 = arith.constant 0.000000e+00 : f32
    %121 = vector.broadcast %cst_54 : f32 to vector<64x64xf32>
    %122 = arith.select %119, %121, %120 : vector<64x64xi1>, vector<64x64xf32>
    %123 = tpu.concatenate %117, %95, %122 in 1 : vector<64x64xf32>, vector<64x64xf32>, vector<64x64xf32> -> vector<64x192xf32>
    %c1_55 = arith.constant 1 : index
    %c0_56 = arith.constant 0 : index
    %c0_57 = arith.constant 0 : index
    %124 = vector.load %arg3[%c1_55, %c0_56, %c0_57] : memref<3x192x64xf32, #tpu.memory_space<vmem>>, vector<1x192x64xf32>
    %125 = vector.shape_cast %124 : vector<1x192x64xf32> to vector<192x64xf32>
    %cst_58 = arith.constant dense<0.000000e+00> : vector<64x64xf32>
    %126 = tpu.matmul %123, %125, %cst_58 {dimension_numbers = #tpu.dot_dimension_numbers<[1], [0], [0], [1], [0, 0, 1, 1], [], []>} : vector<64x192xf32>, vector<192x64xf32>, vector<64x64xf32> -> vector<64x64xf32>
    %c2_59 = arith.constant 2 : index
    %c0_60 = arith.constant 0 : index
    %127 = vector.load %arg4[%c2_59, %c0_60] : memref<4x64xf32, #tpu.memory_space<vmem>>, vector<1x64xf32>
    %c2_61 = arith.constant 2 : index
    %c0_62 = arith.constant 0 : index
    %128 = vector.load %arg5[%c2_61, %c0_62] : memref<4x64xf32, #tpu.memory_space<vmem>>, vector<1x64xf32>
    %129 = vector.broadcast %127 : vector<1x64xf32> to vector<64x64xf32>
    %130 = arith.mulf %126, %129 : vector<64x64xf32>
    %131 = vector.broadcast %128 : vector<1x64xf32> to vector<64x64xf32>
    %132 = arith.addf %130, %131 : vector<64x64xf32>
    %cst_63 = arith.constant 0.000000e+00 : f32
    %133 = vector.broadcast %cst_63 : f32 to vector<64x64xf32>
    %134 = arith.maximumf %132, %133 : vector<64x64xf32>
    %c63_i32_64 = arith.constant 63 : i32
    %135 = tpu.dynamic_rotate %134 by %c63_i32_64 dim 0 : vector<64x64xf32>, i32 -> vector<64x64xf32>
    %136 = arith.maximumf %134, %135 : vector<64x64xf32>
    %c0_65 = arith.constant 0 : index
    %c0_66 = arith.constant 0 : index
    %137 = vector.load %arg7[%c0_65, %c0_66] : memref<256x64xf32, #tpu.memory_space<vmem>>, vector<64x64xf32>
    tpu.vector_store %arg7[%c0_65, %c0_66], %136 {strides = array<i32>} : memref<256x64xf32, #tpu.memory_space<vmem>>, vector<64x64xf32>,
    %c0_67 = arith.constant 0 : index
    %c0_68 = arith.constant 0 : index
    %138 = tpu.strided_load %arg7[%c0_67, %c0_68] {strides = array<i32: 2, 1>} : memref<256x64xf32, #tpu.memory_space<vmem>>, vector<32x64xf32>
    %139 = tpu.iota {dimensions = array<i32: 0>} : vector<32x64xi32>
    %c16_i32 = arith.constant 16 : i32
    %c0_i32_69 = arith.constant 0 : i32
    %140 = arith.cmpi eq, %c16_i32, %c0_i32_69 : i32
    %c1_i32_70 = arith.constant 1 : i32
    %141 = arith.select %140, %c1_i32_70, %c16_i32 : i32
    %142 = vector.broadcast %141 : i32 to vector<32x64xi32>
    %143 = arith.remsi %139, %142 : vector<32x64xi32>
    %c0_i32_71 = arith.constant 0 : i32
    %144 = vector.broadcast %c0_i32_71 : i32 to vector<32x64xi32>
    %145 = arith.cmpi ne, %143, %144 : vector<32x64xi32>
    %c0_i32_72 = arith.constant 0 : i32
    %146 = vector.broadcast %c0_i32_72 : i32 to vector<32x64xi32>
    %147 = arith.cmpi slt, %143, %146 : vector<32x64xi32>
    %c0_i32_73 = arith.constant 0 : i32
    %148 = arith.cmpi slt, %141, %c0_i32_73 : i32
    %149 = vector.broadcast %148 : i1 to vector<32x64xi1>
    %150 = vector.broadcast %149 : vector<32x64xi1> to vector<32x64xi1>
    %151 = arith.xori %147, %150 : vector<32x64xi1>
    %152 = arith.andi %151, %145 : vector<32x64xi1>
    %153 = vector.broadcast %141 : i32 to vector<32x64xi32>
    %154 = arith.addi %143, %153 : vector<32x64xi32>
    %155 = arith.select %152, %154, %143 : vector<32x64xi1>, vector<32x64xi32>
    %c0_i32_74 = arith.constant 0 : i32
    %156 = vector.broadcast %c0_i32_74 : i32 to vector<32x64xi32>
    %157 = arith.cmpi eq, %155, %156 : vector<32x64xi32>
    %c1_i32_75 = arith.constant 1 : i32
    %158 = tpu.dynamic_rotate %138 by %c1_i32_75 dim 0 : vector<32x64xf32>, i32 -> vector<32x64xf32>
    %cst_76 = arith.constant 0.000000e+00 : f32
    %159 = vector.broadcast %cst_76 : f32 to vector<32x64xf32>
    %160 = arith.select %157, %159, %158 : vector<32x64xi1>, vector<32x64xf32>
    %c15_i32 = arith.constant 15 : i32
    %161 = vector.broadcast %c15_i32 : i32 to vector<32x64xi32>
    %162 = arith.cmpi eq, %155, %161 : vector<32x64xi32>
    %c31_i32_77 = arith.constant 31 : i32
    %163 = tpu.dynamic_rotate %138 by %c31_i32_77 dim 0 : vector<32x64xf32>, i32 -> vector<32x64xf32>
    %cst_78 = arith.constant 0.000000e+00 : f32
    %164 = vector.broadcast %cst_78 : f32 to vector<32x64xf32>
    %165 = arith.select %162, %164, %163 : vector<32x64xi1>, vector<32x64xf32>
    %166 = tpu.concatenate %160, %138, %165 in 1 : vector<32x64xf32>, vector<32x64xf32>, vector<32x64xf32> -> vector<32x192xf32>
    %c2_79 = arith.constant 2 : index
    %c0_80 = arith.constant 0 : index
    %c0_81 = arith.constant 0 : index
    %167 = vector.load %arg3[%c2_79, %c0_80, %c0_81] : memref<3x192x64xf32, #tpu.memory_space<vmem>>, vector<1x192x64xf32>
    %168 = vector.shape_cast %167 : vector<1x192x64xf32> to vector<192x64xf32>
    %cst_82 = arith.constant dense<0.000000e+00> : vector<32x64xf32>
    %169 = tpu.matmul %166, %168, %cst_82 {dimension_numbers = #tpu.dot_dimension_numbers<[1], [0], [0], [1], [0, 0, 1, 1], [], []>} : vector<32x192xf32>, vector<192x64xf32>, vector<32x64xf32> -> vector<32x64xf32>
    %c3 = arith.constant 3 : index
    %c0_83 = arith.constant 0 : index
    %170 = vector.load %arg4[%c3, %c0_83] : memref<4x64xf32, #tpu.memory_space<vmem>>, vector<1x64xf32>
    %c3_84 = arith.constant 3 : index
    %c0_85 = arith.constant 0 : index
    %171 = vector.load %arg5[%c3_84, %c0_85] : memref<4x64xf32, #tpu.memory_space<vmem>>, vector<1x64xf32>
    %172 = vector.broadcast %170 : vector<1x64xf32> to vector<32x64xf32>
    %173 = arith.mulf %169, %172 : vector<32x64xf32>
    %174 = vector.broadcast %171 : vector<1x64xf32> to vector<32x64xf32>
    %175 = arith.addf %173, %174 : vector<32x64xf32>
    %cst_86 = arith.constant 0.000000e+00 : f32
    %176 = vector.broadcast %cst_86 : f32 to vector<32x64xf32>
    %177 = arith.maximumf %175, %176 : vector<32x64xf32>
    %c31_i32_87 = arith.constant 31 : i32
    %178 = tpu.dynamic_rotate %177 by %c31_i32_87 dim 0 : vector<32x64xf32>, i32 -> vector<32x64xf32>
    %179 = arith.maximumf %177, %178 : vector<32x64xf32>
    %c0_88 = arith.constant 0 : index
    %c0_89 = arith.constant 0 : index
    %180 = vector.load %arg7[%c0_88, %c0_89] : memref<256x64xf32, #tpu.memory_space<vmem>>, vector<32x64xf32>
    tpu.vector_store %arg7[%c0_88, %c0_89], %179 {strides = array<i32>} : memref<256x64xf32, #tpu.memory_space<vmem>>, vector<32x64xf32>,
    %c0_90 = arith.constant 0 : index
    %c0_91 = arith.constant 0 : index
    %181 = tpu.strided_load %arg7[%c0_90, %c0_91] {strides = array<i32: 2, 1>} : memref<256x64xf32, #tpu.memory_space<vmem>>, vector<16x64xf32>
    %c0_92 = arith.constant 0 : index
    %c0_93 = arith.constant 0 : index
    %182 = vector.load %arg6[%c0_92, %c0_93] : memref<16x64xf32, #tpu.memory_space<vmem>>, vector<16x64xf32>
    tpu.vector_store %arg6[%c0_92, %c0_93], %181 {strides = array<i32>} : memref<16x64xf32, #tpu.memory_space<vmem>>, vector<16x64xf32>,
    return
  }
  func.func @transform_0(%arg0: i32) -> (i32, i32) {
    %c0_i32 = arith.constant 0 : i32
    %c0_i32_0 = arith.constant 0 : i32
    return %arg0, %c0_i32 : i32, i32
  }
  func.func @transform_1(%arg0: i32) -> (i32, i32) {
    %c0_i32 = arith.constant 0 : i32
    %c0_i32_0 = arith.constant 0 : i32
    %c0_i32_1 = arith.constant 0 : i32
    return %c0_i32, %c0_i32_0 : i32, i32
  }
  func.func @transform_2(%arg0: i32) -> (i32, i32, i32) {
    %c0_i32 = arith.constant 0 : i32
    %c0_i32_0 = arith.constant 0 : i32
    %c0_i32_1 = arith.constant 0 : i32
    %c0_i32_2 = arith.constant 0 : i32
    return %c0_i32, %c0_i32_0, %c0_i32_1 : i32, i32, i32
  }
  func.func @transform_3(%arg0: i32) -> (i32, i32) {
    %c0_i32 = arith.constant 0 : i32
    %c0_i32_0 = arith.constant 0 : i32
    %c0_i32_1 = arith.constant 0 : i32
    return %c0_i32, %c0_i32_0 : i32, i32
  }
  func.func @transform_4(%arg0: i32) -> (i32, i32) {
    %c0_i32 = arith.constant 0 : i32
    %c0_i32_0 = arith.constant 0 : i32
    %c0_i32_1 = arith.constant 0 : i32
    return %c0_i32, %c0_i32_0 : i32, i32
  }
  func.func @transform_5(%arg0: i32) -> (i32, i32) {
    %c0_i32 = arith.constant 0 : i32
    %c0_i32_0 = arith.constant 0 : i32
    return %arg0, %c0_i32 : i32, i32
  }
}

</mosaic_0001>

<bundles_post_ra>
// kernel: _lambda_.1
= control target key start
LH: loop header
LB: loop body
LE: loop exit
PB: predicated region body
PF: predicated region fallthrough
CT: control target
= control target key end

     0   :  { %10 = vsyncpa [#allocation4], 0  ;;  %s3322_s18 = smov 0   ;;  %s4624_s0 = inlined_call_operand.vmem [shape: f32[512,1], index: 0, kind: input, shape index: {}]   ;;  %s4625_s1 = inlined_call_operand.vmem [shape: f32[3,64], index: 1, kind: input, shape index: {}]   ;;  %s4626_s2 = inlined_call_operand.hbm [shape: f32[3,192,64], index: 2, kind: input, shape index: {}]   ;;  %s4627_s3 = inlined_call_operand.vmem [shape: f32[4,64], index: 3, kind: input, shape index: {}]   ;;  %s4628_s4 = inlined_call_operand.vmem [shape: f32[4,64], index: 4, kind: input, shape index: {}]   ;;  %s4629_s5 = inlined_call_operand.vmem [shape: f32[32,64], index: 5, kind: output, shape index: {}]  }
   0x1 LB: > { %s3328_s19 = sadd.s32 4294967295, %s3284_s18   ;;  %p3056_p0 = scmp.ge.s32.totalorder %s3284_s18, 1  ;;  %s3284_s18 = sphi %s3322_s18, %s16_s18  }
   0x2   : > { %p157_p1 = scmp.lt.s32.totalorder %s3284_s18, 3  ;;  %s3286_s20 = smov [#allocation3]  }
   0x3   : > { %s172_s21 = sshll.u32 %s3286_s20, 4  ;;  %p4630_p3 = scmp.eq.s32.totalorder %s3328_s19, 0  ;;  %s173_s21 = int_to_ptr.vmem [resolvable:$true] %s172_s21 }
   0x4   : > { %p3332_p2 = pnand %p3056_p0, %p157_p1  ;;  %s3246_s26 = scalar_lea.hbm %s4626_s2, 9216 }
   0x5   : > { %p3247_p6 = scmp.ne.s32.totalorder %s4626_s2, %s3246_s26  ;;  %p3253_p10 = scmp.lt.u32.totalorder %s3246_s26, %s4626_s2 }
   0x6   : > { %s4632_s22 = scalar_select %p3332_p2, 1, 0 }
   0x7   : > { %p3218_p4 = pneg %p3332_p2 }
   0x9   : > { %p3341_p5 = pnand %p4630_p3, %p3218_p4 }
   0xb   : > { %p3248_p7 = pneg %p3341_p5 }
   0xd   : > { %p3249_p8 = pnand %p3248_p7, %p3247_p6 }
   0xf   : > { %p3250_p9 = pneg %p3249_p8 }
  0x11   : > { %p3255_p11 = pnand %p3253_p10, %p3250_p9 }
  0x13   : > { %3258 = shalt.err (!%p3255_p11)
}
  0x14   : > { %s3259_s6 = scalar_lea.vmem %s173_s21, 9216  ;;  %p3267_p1 = scmp.lt.s32.totalorder %s173_s21, %s173_s21 }
  0x15   : > { %p3260_p12 = scmp.ne.s32.totalorder %s173_s21, %s3259_s6  ;;  %p3268_p4 = scmp.lt.s32.totalorder %s3259_s6, %s3259_s6 }
  0x17   : > { %p3262_p13 = pnand %p3260_p12, %p3248_p7  ;;  %p3269_p3 = por %p3268_p4, %p3267_p1 }
  0x19   : > { %p3263_p0 = pneg %p3262_p13 }
  0x1b   : > { %p3270_p2 = pnand %p3269_p3, %p3263_p0 }
  0x1d   : > { %3273 = shalt.err (!%p3270_p2)
}
  0x1e   : > { %s3287_s7 = smov 128   ;;  %s3288_s8 = smov 8  }
  0x1f   : > { %3221 = dma.hbm_to_vmem [thread:$0]  (!%p3341_p5), %s4626_s2, 9216, %s173_s21, [#allocation4], %s3287_s7, %s3287_s7, %s3288_s8  }
  0x20   : > { %p4634_p6 = scmp.ne.s32.totalorder %s4632_s22, 0 }
  0x21   : > { %p4635_p8 = scmp.eq.s32.totalorder (!%p4634_p6), %s3328_s19, 0 }
  0x22   : > { %203 = sbr.rel (%p4634_p6) target bundleno = 1364 (0x554), region = 40 }
  0x29   : > { %3279 = dma.done.wait (%p4635_p8), [#allocation4], 9216   ;;  %p4636_p7 = pmov %p4635_p8 }
  0x2a   : > { %s3061_s11 = sshll.u32 %s3328_s19, 5  ;;  %v3289_v0 = vmov 0   ;;  %v435_v33 = vlaneseq  ;;  %v3413_v41 = vld [vmem:[%s4625_s1] ss:$0 sm:$0xff]  ;;  %v3421_v44 = vld [vmem:[%s4625_s1 + $0x1] ss:$0 sm:$0xff] }
  0x2b   : > { %3281 = vsyncadd (%p4636_p7), [#allocation4], 4294958080  ;;  %3239 = vset.pattern.permute.xlu1 %v3289_v0  ;;  %3238 = vset.pattern.permute.xlu0 %v3289_v0  ;;  %p232_p2 = scmp.lt.s32.totalorder %s3061_s11, 63  ;;  %v3449_v62 = vld [vmem:[%s4625_s1 + $0x2] ss:$0 sm:$0xff]  ;;  %vm1487_vm4 = vcmask 523264  }
  0x2c   : > { %v3405_v34 = vshrl.u32 %v435_v33, 7  ;;  %s3290_s28 = smov 64  }
  0x2d   : > { %s4646_s11 = smov (!%p232_p2, %s3061_s11), 63 }
  0x2e   : > { %s3062_s12 = sshll.u32 %s4646_s11, 3  ;;  %v467_v35 = vadd.s32 248, %v3405_v34  ;;  %vm916_vm0 = vcmp.lt.s32.totalorder %v3405_v34, 1  ;;  %v472_v38 = vand.u32 127, %v3405_v34  ;;  %v3416_v43 = vadd.s32 120, %v3405_v34 }
  0x2f   : > { %s3371_s15 = scalar_lea.vmem %s4624_s0, %s3062_s12  ;;  %v3424_v45 = vadd.s32 128, %v3405_v34  ;;  %vm1045_vm1 = vcmp.lt.s32.totalorder %v3405_v34, 7 }
  0x30   : > { %v244_v1 = vld [vmem:[%s3371_s15 + $0x8] sm:$0xff]  ;;  %v243_v2 = vld [vmem:[%s3371_s15] sm:$0xff]  ;;  %v245_v3 = vld [vmem:[%s3371_s15 + $0x10] sm:$0xff]  ;;  %v689_v39 = vand.u32 127, %v467_v35  ;;  %vm3430_vm2 = vcmp.eq.s32.totalorder %v472_v38, 0  ;;  %v577_v57 = vand.u32 127, %v3416_v43 }
  0x31   : > { %282 = vperm.xlu1 %3239, %v244_v1   ;;  %277 = vperm.xlu0 %3238, %v243_v2   ;;  %v274_v4 = vld [vmem:[%s3371_s15 + $0xf8] sm:$0xff]  ;;  %v247_v5 = vld [vmem:[%s3371_s15 + $0x20] sm:$0xff]  ;;  %v249_v7 = vld [vmem:[%s3371_s15 + $0x30] sm:$0xff]  ;;  %v584_v61 = vand.u32 127, %v3424_v45 }
  0x32   : > { %v246_v6 = vld [vmem:[%s3371_s15 + $0x18] sm:$0xff]  ;;  %v248_v8 = vld [vmem:[%s3371_s15 + $0x28] sm:$0xff]  ;;  %v251_v9 = vld [vmem:[%s3371_s15 + $0x40] sm:$0xff]  ;;  %vm3434_vm3 = vcmp.eq.s32.totalorder %v689_v39, 127  ;;  %vm3677_vm6 = vcmp.eq.s32.totalorder %v577_v57, 127 }
  0x33   : > { %v250_v10 = vld [vmem:[%s3371_s15 + $0x38] sm:$0xff]  ;;  %v253_v11 = vld [vmem:[%s3371_s15 + $0x50] sm:$0xff]  ;;  %v252_v12 = vld [vmem:[%s3371_s15 + $0x48] sm:$0xff]  ;;  %vm3661_vm5 = vcmp.eq.s32.totalorder %v584_v61, 0 }
  0x34   : > { %v255_v13 = vld [vmem:[%s3371_s15 + $0x60] sm:$0xff]  ;;  %v254_v14 = vld [vmem:[%s3371_s15 + $0x58] sm:$0xff]  ;;  %v257_v15 = vld [vmem:[%s3371_s15 + $0x70] sm:$0xff] }
  0x35   : > { %287 = vperm.xlu1 %3239, %v245_v3   ;;  %432 = vperm.xlu0 %3238, %v274_v4   ;;  %v256_v16 = vld [vmem:[%s3371_s15 + $0x68] sm:$0xff]  ;;  %v259_v17 = vld [vmem:[%s3371_s15 + $0x80] sm:$0xff]  ;;  %v258_v18 = vld [vmem:[%s3371_s15 + $0x78] sm:$0xff] }
  0x36   : > { %v261_v19 = vld [vmem:[%s3371_s15 + $0x90] sm:$0xff]  ;;  %v260_v20 = vld [vmem:[%s3371_s15 + $0x88] sm:$0xff]  ;;  %v263_v21 = vld [vmem:[%s3371_s15 + $0xa0] sm:$0xff] }
  0x37   : > { %v262_v22 = vld [vmem:[%s3371_s15 + $0x98] sm:$0xff]  ;;  %v265_v23 = vld [vmem:[%s3371_s15 + $0xb0] sm:$0xff]  ;;  %v264_v24 = vld [vmem:[%s3371_s15 + $0xa8] sm:$0xff] }
  0x38   : > { %v267_v25 = vld [vmem:[%s3371_s15 + $0xc0] sm:$0xff]  ;;  %v266_v26 = vld [vmem:[%s3371_s15 + $0xb8] sm:$0xff]  ;;  %v269_v27 = vld [vmem:[%s3371_s15 + $0xd0] sm:$0xff] }
  0x39   : > { %297 = vperm.xlu1 %3239, %v247_v5   ;;  %292 = vperm.xlu0 %3238, %v246_v6   ;;  %v268_v28 = vld [vmem:[%s3371_s15 + $0xc8] sm:$0xff]  ;;  %v271_v29 = vld [vmem:[%s3371_s15 + $0xe0] sm:$0xff]  ;;  %v270_v30 = vld [vmem:[%s3371_s15 + $0xd8] sm:$0xff] }
  0x3a   : > { %v273_v31 = vld [vmem:[%s3371_s15 + $0xf0] sm:$0xff]  ;;  %v272_v32 = vld [vmem:[%s3371_s15 + $0xe8] sm:$0xff] }
  0x3d   : > { %307 = vperm.xlu1 %3239, %v249_v7   ;;  %302 = vperm.xlu0 %3238, %v248_v8  }
  0x41   : > { %317 = vperm.xlu1 %3239, %v251_v9   ;;  %312 = vperm.xlu0 %3238, %v250_v10   ;;  %v3472_v9 = vld [vmem:[%s4627_s3] ss:$0 sm:$0xff] }
  0x45   : > { %327 = vperm.xlu1 %3239, %v253_v11   ;;  %322 = vperm.xlu0 %3238, %v252_v12  }
  0x49   : > { %337 = vperm.xlu1 %3239, %v255_v13   ;;  %332 = vperm.xlu0 %3238, %v254_v14  }
  0x4d   : > { %347 = vperm.xlu1 %3239, %v257_v15   ;;  %342 = vperm.xlu0 %3238, %v256_v16  }
  0x51   : > { %357 = vperm.xlu1 %3239, %v259_v17   ;;  %352 = vperm.xlu0 %3238, %v258_v18   ;;  %v3486_v18 = vld [vmem:[%s4628_s4] ss:$0 sm:$0xff] }
  0x55   : > { %367 = vperm.xlu1 %3239, %v261_v19   ;;  %362 = vperm.xlu0 %3238, %v260_v20  }
  0x59   : > { %377 = vperm.xlu1 %3239, %v263_v21   ;;  %372 = vperm.xlu0 %3238, %v262_v22  }
  0x5d   : > { %387 = vperm.xlu1 %3239, %v265_v23   ;;  %382 = vperm.xlu0 %3238, %v264_v24  }
  0x61   : > { %397 = vperm.xlu1 %3239, %v267_v25   ;;  %392 = vperm.xlu0 %3238, %v266_v26  }
  0x65   : > { %407 = vperm.xlu1 %3239, %v269_v27   ;;  %402 = vperm.xlu0 %3238, %v268_v28  }
  0x69   : > { %417 = vperm.xlu1 %3239, %v271_v29   ;;  %412 = vperm.xlu0 %3238, %v270_v30  }
  0x6d   : > { %427 = vperm.xlu1 %3239, %v273_v31   ;;  %422 = vperm.xlu0 %3238, %v272_v32  }
  0xb0   : > { %v283_v36 = vpop.permute.xlu1 %282  ;;  %v278_v37 = vpop.permute.xlu0 %277 }
  0xb1   : > { %v885_v40 = vrot.slane %v283_v36, 7  ;;  %v884_v42 = vrot.slane %v278_v37, 7  ;;  %v1014_v46 = vrot.slane %v283_v36, 1  ;;  %v1013_v48 = vrot.slane %v278_v37, 1 }
  0xb2   : > { %v1153_v54 = vmul.f32 %v3421_v44, %v283_v36  ;;  %v1152_v58 = vmul.f32 %v3421_v44, %v278_v37 }
  0xb3   : > { %v947_v47 = vsel %vm916_vm0, %v884_v42, %v885_v40  ;;  %v1076_v63 = vsel %vm1045_vm1, %v1013_v48, %v1014_v46 }
  0xb4   : > { %v1116_v49 = vmul.f32 %v3413_v41, %v947_v47  ;;  %v288_v50 = vpop.permute.xlu1 %287  ;;  %v3438_v53 = vpop.permute.xlu0 %432  ;;  %v1221_v14 = vmul.f32 %v3449_v62, %v1076_v63 }
  0xb5   : > { %v886_v55 = vrot.slane %v288_v50, 7  ;;  %v1015_v56 = vrot.slane %v288_v50, 1  ;;  %v915_v59 = vrot.slane %v3438_v53, 7  ;;  %v1044_v60 = vrot.slane %v3438_v53, 1 }
  0xb6   : > { %v1185_v0 = vadd.f32 %v1153_v54, %v1116_v49  ;;  %v1154_v10 = vmul.f32 %v3421_v44, %v288_v50  ;;  %v3481_v17 = vmul.f32 %v3421_v44, %v3438_v53 }
  0xb7   : > { %v946_v1 = vsel %vm916_vm0, %v885_v40, %v886_v55  ;;  %v1075_v2 = vsel %vm1045_vm1, %v1014_v46, %v1015_v56  ;;  %v948_v5 = vsel %vm916_vm0, %v915_v59, %v884_v42  ;;  %v3467_v6 = vsel %vm1045_vm1, %v1044_v60, %v1013_v48 }
  0xb8   : > { %v1117_v3 = vmul.f32 %v3413_v41, %v946_v1  ;;  %v1222_v4 = vmul.f32 %v3449_v62, %v1075_v2  ;;  %v298_v7 = vpop.permute.xlu1 %297  ;;  %v293_v8 = vpop.permute.xlu0 %292  ;;  %v949_v11 = vsel %vm3430_vm2, 0.0, %v948_v5  ;;  %v1109_v20 = vsel %vm3434_vm3, 0.0, %v3467_v6 }
  0xb9   : > { %v888_v12 = vrot.slane %v298_v7, 7  ;;  %v1017_v13 = vrot.slane %v298_v7, 1  ;;  %v1115_v16 = vmul.f32 %v3413_v41, %v949_v11  ;;  %v887_v21 = vrot.slane %v293_v8, 7 }
  0xba   : > { %v1254_v15 = vadd.f32 %v1222_v4, %v1185_v0  ;;  %v1186_v19 = vadd.f32 %v1154_v10, %v1117_v3  ;;  %v1016_v22 = vrot.slane %v293_v8, 1  ;;  %v1156_v25 = vmul.f32 %v3421_v44, %v298_v7 }
  0xbb   : > { %v1184_v24 = vadd.f32 %v1152_v58, %v1115_v16  ;;  %v1155_v26 = vmul.f32 %v3421_v44, %v293_v8  ;;  %v944_v28 = vsel %vm916_vm0, %v887_v21, %v888_v12  ;;  %v945_v29 = vsel %vm916_vm0, %v886_v55, %v887_v21 }
  0xbc   : > { %v1292_v23 = vmul.f32 %v3472_v9, %v1254_v15  ;;  %v3494_v27 = vpop.permute.xlu1 %307  ;;  %v1073_v30 = vsel %vm1045_vm1, %v1016_v22, %v1017_v13  ;;  %v1074_v31 = vsel %vm1045_vm1, %v1015_v56, %v1016_v22  ;;  %v1118_v35 = vmul.f32 %v3413_v41, %v945_v29  ;;  %v303_v37 = vpop.permute.xlu0 %302 }
  0xbd   : > { %v1253_v33 = vadd.f32 %v1221_v14, %v1184_v24  ;;  %v1119_v36 = vmul.f32 %v3413_v41, %v944_v28  ;;  %v1223_v38 = vmul.f32 %v3449_v62, %v1074_v31  ;;  %v1224_v39 = vmul.f32 %v3449_v62, %v1073_v30 }
  0xbe   : > { %v3505_v32 = vadd.f32 %v3486_v18, %v1292_v23  ;;  %v890_v40 = vrot.slane %v3494_v27, 7  ;;  %v1019_v42 = vrot.slane %v3494_v27, 1  ;;  %v1187_v48 = vadd.f32 %v1155_v26, %v1118_v35 }
  0xbf   : > { %v1291_v47 = vmul.f32 %v3472_v9, %v1253_v33  ;;  %v1188_v49 = vadd.f32 %v1156_v25, %v1119_v36  ;;  %v1255_v50 = vadd.f32 %v1223_v38, %v1186_v19  ;;  %v1158_v51 = vmul.f32 %v3421_v44, %v3494_v27 }
  0xc0   : > { %v1360_v46 = vmax.f32 %v3505_v32, 0.0  ;;  %v889_v54 = vrot.slane %v303_v37, 7  ;;  %v1018_v55 = vrot.slane %v303_v37, 1  ;;  %v1256_v63 = vadd.f32 %v1224_v39, %v1187_v48  ;;  %v3526_v5 = vpop.permute.xlu1 %317  ;;  %v313_v24 = vpop.permute.xlu0 %312 }
  0xc1   : > { %v1327_v58 = vadd.f32 %v3486_v18, %v1291_v47  ;;  %v1157_v0 = vmul.f32 %v3421_v44, %v303_v37  ;;  %v1293_v1 = vmul.f32 %v3472_v9, %v1255_v50  ;;  %v892_v23 = vrot.slane %v3526_v5, 7 }
  0xc2   : > { %v1392_v56 = vrot.slane %v1360_v46, 1  ;;  %v942_v2 = vsel %vm916_vm0, %v889_v54, %v890_v40  ;;  %v943_v3 = vsel %vm916_vm0, %v888_v12, %v889_v54  ;;  %v1071_v4 = vsel %vm1045_vm1, %v1018_v55, %v1019_v42 }
  0xc3   : > { %v1359_v7 = vmax.f32 %v1327_v58, 0.0  ;;  %v1294_v8 = vmul.f32 %v3472_v9, %v1256_v63  ;;  %v1072_v10 = vsel %vm1045_vm1, %v1017_v13, %v1018_v55  ;;  %v1120_v11 = vmul.f32 %v3413_v41, %v943_v3 }
  0xc4   : > { %v1329_v14 = vadd.f32 %v3486_v18, %v1293_v1  ;;  %v1121_v15 = vmul.f32 %v3413_v41, %v942_v2  ;;  %v1225_v16 = vmul.f32 %v3449_v62, %v1072_v10  ;;  %v1226_v12 = vmul.f32 %v3449_v62, %v1071_v4  ;;  %v3549_v48 = vpop.permute.xlu1 %327 }
  0xc5   : > { %v3536_v19 = vrot.slane %v1359_v7, 1  ;;  %v1330_v21 = vadd.f32 %v3486_v18, %v1294_v8  ;;  %v1189_v22 = vadd.f32 %v1157_v0, %v1120_v11  ;;  %v1021_v27 = vrot.slane %v3526_v5, 1 }
  0xc6   : > { %v1361_v25 = vmax.f32 %v1329_v14, 0.0  ;;  %v1190_v13 = vadd.f32 %v1158_v51, %v1121_v15  ;;  %v1257_v26 = vadd.f32 %v1225_v16, %v1188_v49  ;;  %v1160_v31 = vmul.f32 %v3421_v44, %v3526_v5 }
  0xc7   : > { %v1453_v28 = vsel %vm1045_vm1, %v3536_v19, %v1392_v56  ;;  %v1362_v29 = vmax.f32 %v1330_v21, 0.0  ;;  %v1258_v30 = vadd.f32 %v1226_v12, %v1189_v22  ;;  %v891_v36 = vrot.slane %v313_v24, 7 }
  0xc8   : > { %v1455_v32 = vmax.f32 %v1359_v7, %v1453_v28  ;;  %v1393_v33 = vrot.slane %v1361_v25, 1  ;;  %v1295_v35 = vmul.f32 %v3472_v9, %v1257_v26  ;;  %v1020_v39 = vrot.slane %v313_v24, 1  ;;  %v323_v7 = vpop.permute.xlu0 %322  ;;  %v3581_v21 = vpop.permute.xlu1 %337 }
  0xc9   : > { %v1394_v37 = vrot.slane %v1362_v29, 1  ;;  %v1296_v38 = vmul.f32 %v3472_v9, %v1258_v30  ;;  %v1159_v47 = vmul.f32 %v3421_v44, %v313_v24  ;;  %v940_v51 = vsel %vm916_vm0, %v891_v36, %v892_v23 }
  0xca   : > { %1488 = vst.msk [vmem:[#allocation2] sm:$0xff] %vm1487_vm4, %v1455_v32  ;;  %v1452_v49 = vsel %vm1045_vm1, %v1392_v56, %v1393_v33  ;;  %v1331_v50 = vadd.f32 %v3486_v18, %v1295_v35  ;;  %v941_v54 = vsel %vm916_vm0, %v890_v40, %v891_v36  ;;  %v1069_v0 = vsel %vm1045_vm1, %v1020_v39, %v1021_v27 }
  0xcb   : > { %v1451_v55 = vsel %vm1045_vm1, %v1393_v33, %v1394_v37  ;;  %v1456_v58 = vmax.f32 %v1360_v46, %v1452_v49  ;;  %v3562_v63 = vadd.f32 %v3486_v18, %v1296_v38  ;;  %v1070_v2 = vsel %vm1045_vm1, %v1019_v42, %v1020_v39 }
  0xcc   : > { %v1457_v1 = vmax.f32 %v1361_v25, %v1451_v55  ;;  %v1363_v56 = vmax.f32 %v1331_v50, 0.0  ;;  %v1122_v3 = vmul.f32 %v3413_v41, %v941_v54  ;;  %v1123_v4 = vmul.f32 %v3413_v41, %v940_v51  ;;  %v333_v50 = vpop.permute.xlu0 %332 }
  0xcd   : > { %1489 = vst.msk [vmem:[#allocation2 + $0x8] sm:$0xff] %vm1487_vm4, %v1456_v58  ;;  %v1364_v40 = vmax.f32 %v3562_v63, 0.0  ;;  %v1227_v46 = vmul.f32 %v3449_v62, %v1070_v2  ;;  %v1228_v5 = vmul.f32 %v3449_v62, %v1069_v0  ;;  %v894_v11 = vrot.slane %v3549_v48, 7  ;;  %v3612_v0 = vpop.permute.xlu1 %347 }
  0xce   : > { %1490 = vst.msk [vmem:[#allocation2 + $0x10] sm:$0xff] %vm1487_vm4, %v1457_v1  ;;  %v1395_v8 = vrot.slane %v1363_v56, 1  ;;  %v1191_v10 = vadd.f32 %v1159_v47, %v1122_v3  ;;  %v1023_v42 = vrot.slane %v3549_v48, 1  ;;  %v1192_v15 = vadd.f32 %v1160_v31, %v1123_v4 }
  0xcf   : > { %v1396_v14 = vrot.slane %v1364_v40, 1  ;;  %v1259_v16 = vadd.f32 %v1227_v46, %v1190_v13  ;;  %v1162_v12 = vmul.f32 %v3421_v44, %v3549_v48  ;;  %v893_v25 = vrot.slane %v323_v7, 7 }
  0xd0   : > { %v1450_v22 = vsel %vm1045_vm1, %v1394_v37, %v1395_v8  ;;  %v1260_v24 = vadd.f32 %v1228_v5, %v1191_v10  ;;  %v1022_v26 = vrot.slane %v323_v7, 1  ;;  %v1161_v31 = vmul.f32 %v3421_v44, %v323_v7  ;;  %v343_v63 = vpop.permute.xlu0 %342 }
  0xd1   : > { %v1449_v28 = vsel %vm1045_vm1, %v1395_v8, %v1396_v14  ;;  %v1458_v30 = vmax.f32 %v1362_v29, %v1450_v22  ;;  %v1297_v32 = vmul.f32 %v3472_v9, %v1259_v16  ;;  %v938_v35 = vsel %vm916_vm0, %v893_v25, %v894_v11 }
  0xd2   : > { %v1459_v13 = vmax.f32 %v1363_v56, %v1449_v28  ;;  %v1298_v33 = vmul.f32 %v3472_v9, %v1260_v24  ;;  %v939_v36 = vsel %vm916_vm0, %v892_v23, %v893_v25  ;;  %v1067_v29 = vsel %vm1045_vm1, %v1022_v26, %v1023_v42 }
  0xd3   : > { %1491 = vst.msk [vmem:[#allocation2 + $0x18] sm:$0xff] %vm1487_vm4, %v1458_v30  ;;  %v1333_v37 = vadd.f32 %v3486_v18, %v1297_v32  ;;  %v1068_v38 = vsel %vm1045_vm1, %v1021_v27, %v1022_v26  ;;  %v1124_v39 = vmul.f32 %v3413_v41, %v939_v36  ;;  %v1125_v48 = vmul.f32 %v3413_v41, %v938_v35 }
  0xd4   : > { %1492 = vst.msk [vmem:[#allocation2 + $0x20] sm:$0xff] %vm1487_vm4, %v1459_v13  ;;  %v3603_v47 = vadd.f32 %v3486_v18, %v1298_v33  ;;  %v1229_v23 = vmul.f32 %v3449_v62, %v1068_v38  ;;  %v1230_v49 = vmul.f32 %v3449_v62, %v1067_v29  ;;  %v3608_v51 = vld [vmem:[#allocation2] ss:$2 sm:$0xff]  ;;  %v896_v27 = vrot.slane %v3581_v21, 7 }
  0xd5   : > { %v1365_v54 = vmax.f32 %v1333_v37, 0.0  ;;  %v1193_v55 = vadd.f32 %v1161_v31, %v1124_v39  ;;  %v1025_v58 = vrot.slane %v3581_v21, 1  ;;  %1887 = vrot.lane.b32.xlu0 %v3608_v51, %s3290_s28  ;;  %v1194_v56 = vadd.f32 %v1162_v12, %v1125_v48 }
  0xd6   : > { %v1366_v1 = vmax.f32 %v3603_v47, 0.0  ;;  %v1261_v2 = vadd.f32 %v1229_v23, %v1192_v15  ;;  %v1164_v3 = vmul.f32 %v3421_v44, %v3581_v21  ;;  %v895_v5 = vrot.slane %v333_v50, 7 }
  0xd7   : > { %v1397_v4 = vrot.slane %v1365_v54, 1  ;;  %v1262_v46 = vadd.f32 %v1230_v49, %v1193_v55  ;;  %v1024_v7 = vrot.slane %v333_v50, 1  ;;  %v1163_v16 = vmul.f32 %v3421_v44, %v333_v50  ;;  %v3657_v50 = vpop.permute.xlu1 %357 }
  0xd8   : > { %v1398_v8 = vrot.slane %v1366_v1, 1  ;;  %v1299_v10 = vmul.f32 %v3472_v9, %v1261_v2  ;;  %v898_v22 = vrot.slane %v3612_v0, 7  ;;  %v936_v15 = vsel %vm916_vm0, %v895_v5, %v896_v27 }
  0xd9   : > { %v1448_v24 = vsel %vm1045_vm1, %v1396_v14, %v1397_v4  ;;  %v1300_v12 = vmul.f32 %v3472_v9, %v1262_v46  ;;  %v937_v25 = vsel %vm916_vm0, %v894_v11, %v895_v5  ;;  %v1065_v14 = vsel %vm1045_vm1, %v1024_v7, %v1025_v58 }
  0xda   : > { %v1447_v26 = vsel %vm1045_vm1, %v1397_v4, %v1398_v8  ;;  %v1460_v28 = vmax.f32 %v1364_v40, %v1448_v24  ;;  %v1335_v30 = vadd.f32 %v3486_v18, %v1299_v10  ;;  %v3638_v32 = vld [vmem:[#allocation2 + $0x10] ss:$2 sm:$0xff]  ;;  %v1066_v11 = vsel %vm1045_vm1, %v1023_v42, %v1024_v7 }
  0xdb   : > { %v1461_v31 = vmax.f32 %v1365_v54, %v1447_v26  ;;  %v3641_v13 = vadd.f32 %v3486_v18, %v1300_v12  ;;  %v1126_v33 = vmul.f32 %v3413_v41, %v937_v25  ;;  %1889 = vrot.lane.b32.xlu1 %v3638_v32, %s3290_s28  ;;  %v1127_v35 = vmul.f32 %v3413_v41, %v936_v15 }
  0xdc   : > { %1493 = vst.msk [vmem:[#allocation2 + $0x28] sm:$0xff] %vm1487_vm4, %v1460_v28  ;;  %v1367_v40 = vmax.f32 %v1335_v30, 0.0  ;;  %v1231_v36 = vmul.f32 %v3449_v62, %v1066_v11  ;;  %v1232_v37 = vmul.f32 %v3449_v62, %v1065_v14  ;;  %v1027_v38 = vrot.slane %v3612_v0, 1  ;;  %v353_v28 = vpop.permute.xlu0 %352 }
  0xdd   : > { %1494 = vst.msk [vmem:[#allocation2 + $0x30] sm:$0xff] %vm1487_vm4, %v1461_v31  ;;  %v1368_v29 = vmax.f32 %v3641_v13, 0.0  ;;  %v1195_v42 = vadd.f32 %v1163_v16, %v1126_v33  ;;  %v1166_v39 = vmul.f32 %v3421_v44, %v3612_v0  ;;  %v1196_v48 = vadd.f32 %v1164_v3, %v1127_v35  ;;  %v3706_v13 = vpop.permute.xlu1 %367 }
  0xde   : > { %v1399_v47 = vrot.slane %v1367_v40, 1  ;;  %v1263_v23 = vadd.f32 %v1231_v36, %v1194_v56  ;;  %v897_v49 = vrot.slane %v343_v63, 7  ;;  %v1026_v4 = vrot.slane %v343_v63, 1 }
  0xdf   : > { %v1400_v55 = vrot.slane %v1368_v29, 1  ;;  %v1264_v2 = vadd.f32 %v1232_v37, %v1195_v42  ;;  %v1165_v46 = vmul.f32 %v3421_v44, %v343_v63  ;;  %v900_v14 = vrot.slane %v3657_v50, 7 }
  0xe0   : > { %v1446_v5 = vsel %vm1045_vm1, %v1398_v8, %v1399_v47  ;;  %v1301_v3 = vmul.f32 %v3472_v9, %v1263_v23  ;;  %v934_v56 = vsel %vm916_vm0, %v897_v49, %v898_v22  ;;  %v935_v45 = vsel %vm916_vm0, %v896_v27, %v897_v49 }
  0xe1   : > { %v1445_v7 = vsel %vm1045_vm1, %v1399_v47, %v1400_v55  ;;  %v1462_v8 = vmax.f32 %v1366_v1, %v1446_v5  ;;  %v1302_v10 = vmul.f32 %v3472_v9, %v1264_v2  ;;  %v1063_v16 = vsel %vm1045_vm1, %v1026_v4, %v1027_v38  ;;  %v3755_v61 = vpop.permute.xlu1 %377 }
  0xe2   : > { %v1463_v24 = vmax.f32 %v1367_v40, %v1445_v7  ;;  %v1337_v27 = vadd.f32 %v3486_v18, %v1301_v3  ;;  %v1064_v57 = vsel %vm1045_vm1, %v1025_v58, %v1026_v4  ;;  %v1128_v12 = vmul.f32 %v3413_v41, %v935_v45 }
  0xe3   : > { %1495 = vst.msk [vmem:[#allocation2 + $0x38] sm:$0xff] %vm1487_vm4, %v1462_v8  ;;  %v3696_v1 = vadd.f32 %v3486_v18, %v1302_v10  ;;  %v1129_v15 = vmul.f32 %v3413_v41, %v934_v56  ;;  %v1233_v25 = vmul.f32 %v3449_v62, %v1064_v57  ;;  %v1234_v26 = vmul.f32 %v3449_v62, %v1063_v16  ;;  %v3701_v30 = vld [vmem:[#allocation2 + $0x20] ss:$2 sm:$0xff] }
  0xe4   : > { %1496 = vst.msk [vmem:[#allocation2 + $0x40] sm:$0xff] %vm1487_vm4, %v1463_v24  ;;  %v1369_v21 = vmax.f32 %v1337_v27, 0.0  ;;  %v1197_v58 = vadd.f32 %v1165_v46, %v1128_v12  ;;  %v1029_v31 = vrot.slane %v3657_v50, 1  ;;  %1891 = vrot.lane.b32.xlu0 %v3701_v30, %s3290_s28  ;;  %v1168_v40 = vmul.f32 %v3421_v44, %v3657_v50  ;;  %v363_v27 = vpop.permute.xlu0 %362 }
  0xe5   : > { %v1370_v11 = vmax.f32 %v3696_v1, 0.0  ;;  %v1198_v33 = vadd.f32 %v1166_v39, %v1129_v15  ;;  %v1265_v63 = vadd.f32 %v1233_v25, %v1196_v48  ;;  %v899_v37 = vrot.slane %v353_v28, 7 }
  0xe6   : > { %v1401_v35 = vrot.slane %v1369_v21, 1  ;;  %v1266_v36 = vadd.f32 %v1234_v26, %v1197_v58  ;;  %v1028_v42 = vrot.slane %v353_v28, 1  ;;  %v1167_v49 = vmul.f32 %v3421_v44, %v353_v28 }
  0xe7   : > { %v1402_v47 = vrot.slane %v1370_v11, 1  ;;  %v1303_v23 = vmul.f32 %v3472_v9, %v1265_v63  ;;  %v902_v2 = vrot.slane %v3706_v13, 7  ;;  %v932_v48 = vsel %vm916_vm0, %v899_v37, %v900_v14 }
  0xe8   : > { %v1444_v4 = vsel %vm1045_vm1, %v1400_v55, %v1401_v35  ;;  %v1304_v39 = vmul.f32 %v3472_v9, %v1266_v36  ;;  %v933_v46 = vsel %vm916_vm0, %v898_v22, %v899_v37  ;;  %v965_v45 = vsel %vm3661_vm5, 0.0, %v932_v48 }
  0xe9   : > { %v1443_v5 = vsel %vm1045_vm1, %v1401_v35, %v1402_v47  ;;  %v1464_v3 = vmax.f32 %v1368_v29, %v1444_v4  ;;  %v1339_v56 = vadd.f32 %v3486_v18, %v1303_v23  ;;  %v1061_v8 = vsel %vm1045_vm1, %v1028_v42, %v1029_v31 }
  0xea   : > { %v1465_v55 = vmax.f32 %v1369_v21, %v1443_v5  ;;  %v3731_v7 = vadd.f32 %v3486_v18, %v1304_v39  ;;  %v1062_v22 = vsel %vm1045_vm1, %v1027_v38, %v1028_v42  ;;  %v3741_v29 = vld [vmem:[#allocation2 + $0x30] ss:$2 sm:$0xff]  ;;  %v1093_v10 = vsel %vm3677_vm6, 0.0, %v1061_v8 }
  0xeb   : > { %1497 = vst.msk [vmem:[#allocation2 + $0x48] sm:$0xff] %vm1487_vm4, %v1464_v3  ;;  %v1371_v54 = vmax.f32 %v1339_v56, 0.0  ;;  %v1130_v16 = vmul.f32 %v3413_v41, %v933_v46  ;;  %v1131_v24 = vmul.f32 %v3413_v41, %v965_v45  ;;  %1893 = vrot.lane.b32.xlu1 %v3741_v29, %s3290_s28  ;;  %v1235_v38 = vmul.f32 %v3449_v62, %v1062_v22  ;;  %v373_v56 = vpop.permute.xlu0 %372 }
  0xec   : > { %1498 = vst.msk [vmem:[#allocation2 + $0x50] sm:$0xff] %vm1487_vm4, %v1465_v55  ;;  %v1372_v0 = vmax.f32 %v3731_v7, 0.0  ;;  %v1236_v57 = vmul.f32 %v3449_v62, %v1093_v10  ;;  %v1031_v12 = vrot.slane %v3706_v13, 1  ;;  %v1170_v26 = vmul.f32 %v3421_v44, %v3706_v13 }
  0xed   : > { %v1403_v1 = vrot.slane %v1371_v54, 1  ;;  %v1199_v15 = vadd.f32 %v1167_v49, %v1130_v16  ;;  %v1200_v25 = vadd.f32 %v1168_v40, %v1131_v24  ;;  %v1267_v21 = vadd.f32 %v1235_v38, %v1198_v33 }
  0xee   : > { %v1404_v28 = vrot.slane %v1372_v0, 1  ;;  %v901_v58 = vrot.slane %v363_v27, 7  ;;  %v1030_v63 = vrot.slane %v363_v27, 1  ;;  %v1169_v37 = vmul.f32 %v3421_v44, %v363_v27 }
  0xef   : > { %v1442_v35 = vsel %vm1045_vm1, %v1402_v47, %v1403_v1  ;;  %v1268_v36 = vadd.f32 %v1236_v57, %v1199_v15  ;;  %v904_v42 = vrot.slane %v3755_v61, 7  ;;  %v1305_v40 = vmul.f32 %v3472_v9, %v1267_v21 }
  0xf0   : > { %v1441_v23 = vsel %vm1045_vm1, %v1403_v1, %v1404_v28  ;;  %v1466_v49 = vmax.f32 %v1370_v11, %v1442_v35  ;;  %v930_v33 = vsel %vm916_vm0, %v901_v58, %v902_v2  ;;  %v931_v47 = vsel %vm916_vm0, %v900_v14, %v901_v58 }
  0xf1   : > { %v1467_v4 = vmax.f32 %v1371_v54, %v1441_v23  ;;  %v1306_v39 = vmul.f32 %v3472_v9, %v1268_v36  ;;  %v1059_v48 = vsel %vm1045_vm1, %v1030_v63, %v1031_v12  ;;  %v1341_v11 = vadd.f32 %v3486_v18, %v1305_v40  ;;  %v3818_v40 = vpop.permute.xlu1 %387 }
  0xf2   : > { %1499 = vst.msk [vmem:[#allocation2 + $0x58] sm:$0xff] %vm1487_vm4, %v1466_v49  ;;  %v1060_v46 = vsel %vm1045_vm1, %v1029_v31, %v1030_v63  ;;  %v1132_v5 = vmul.f32 %v3413_v41, %v931_v47  ;;  %v1133_v3 = vmul.f32 %v3413_v41, %v930_v33  ;;  %v3783_v45 = vld [vmem:[#allocation2 + $0x40] ss:$2 sm:$0xff]  ;;  %v1238_v7 = vmul.f32 %v3449_v62, %v1059_v48 }
  0xf3   : > { %1500 = vst.msk [vmem:[#allocation2 + $0x60] sm:$0xff] %vm1487_vm4, %v1467_v4  ;;  %v1342_v14 = vadd.f32 %v3486_v18, %v1306_v39  ;;  %v1237_v55 = vmul.f32 %v3449_v62, %v1060_v46  ;;  %v1033_v50 = vrot.slane %v3755_v61, 1  ;;  %1895 = vrot.lane.b32.xlu0 %v3783_v45, %s3290_s28  ;;  %v1373_v31 = vmax.f32 %v1341_v11, 0.0  ;;  %v383_v46 = vpop.permute.xlu0 %382 }
  0xf4   : > { %v1201_v8 = vadd.f32 %v1169_v37, %v1132_v5  ;;  %v1202_v22 = vadd.f32 %v1170_v26, %v1133_v3  ;;  %v1172_v54 = vmul.f32 %v3421_v44, %v3755_v61  ;;  %v903_v24 = vrot.slane %v373_v56, 7 }
  0xf5   : > { %v1374_v10 = vmax.f32 %v1342_v14, 0.0  ;;  %v1269_v16 = vadd.f32 %v1237_v55, %v1200_v25  ;;  %v1032_v27 = vrot.slane %v373_v56, 1  ;;  %v1405_v38 = vrot.slane %v1373_v31, 1 }
  0xf6   : > { %v1270_v57 = vadd.f32 %v1238_v7, %v1201_v8  ;;  %v1171_v1 = vmul.f32 %v3421_v44, %v373_v56  ;;  %v1823_v15 = vrot.slane %v3608_v51, 1  ;;  %v928_v26 = vsel %vm916_vm0, %v903_v24, %v904_v42  ;;  %v2501_v51 = vld [vmem:[#allocation3 + $0xd0] sm:$0xff] }
  0xf7   : > { %v1406_v21 = vrot.slane %v1374_v10, 1  ;;  %v1307_v58 = vmul.f32 %v3472_v9, %v1269_v16  ;;  %v929_v25 = vsel %vm916_vm0, %v902_v2, %v903_v24  ;;  %v1440_v63 = vsel %vm1045_vm1, %v1404_v28, %v1405_v38 }
  0xf8   : > { %v1308_v35 = vmul.f32 %v3472_v9, %v1270_v57  ;;  %v1057_v36 = vsel %vm1045_vm1, %v1032_v27, %v1033_v50  ;;  %v1058_v37 = vsel %vm1045_vm1, %v1031_v12, %v1032_v27  ;;  %v1468_v13 = vmax.f32 %v1372_v0, %v1440_v63 }
  0xf9   : > { %v1439_v23 = vsel %vm1045_vm1, %v1405_v38, %v1406_v21  ;;  %v1343_v49 = vadd.f32 %v3486_v18, %v1307_v58  ;;  %v1134_v2 = vmul.f32 %v3413_v41, %v929_v25  ;;  %v3820_v28 = vld [vmem:[#allocation2 + $0x50] ss:$2 sm:$0xff]  ;;  %v1135_v39 = vmul.f32 %v3413_v41, %v928_v26 }
  0xfa   : > { %v1469_v33 = vmax.f32 %v1373_v31, %v1439_v23  ;;  %v3823_v4 = vadd.f32 %v3486_v18, %v1308_v35  ;;  %v1239_v12 = vmul.f32 %v3449_v62, %v1058_v37  ;;  %1897 = vrot.lane.b32.xlu1 %v3820_v28, %s3290_s28  ;;  %1501 = vst.msk [vmem:[#allocation2 + $0x68] sm:$0xff] %vm1487_vm4, %v1468_v13  ;;  %v1824_v11 = vrot.slane %v3638_v32, 1  ;;  %v3855_v35 = vpop.permute.xlu1 %397 }
  0xfb   : > { %v1375_v0 = vmax.f32 %v1343_v49, 0.0  ;;  %v1203_v47 = vadd.f32 %v1171_v1, %v1134_v2  ;;  %v1240_v48 = vmul.f32 %v3449_v62, %v1057_v36  ;;  %v1204_v3 = vadd.f32 %v1172_v54, %v1135_v39 }
  0xfc   : > { %1502 = vst.msk [vmem:[#allocation2 + $0x70] sm:$0xff] %vm1487_vm4, %v1469_v33  ;;  %v1376_v5 = vmax.f32 %v3823_v4, 0.0  ;;  %v1271_v56 = vadd.f32 %v1239_v12, %v1202_v22  ;;  %v906_v14 = vrot.slane %v3818_v40, 7  ;;  %v1853_v31 = vsel %vm1045_vm1, %v1823_v15, %v1824_v11 }
  0xfd   : > { %v1407_v55 = vrot.slane %v1375_v0, 1  ;;  %v1272_v7 = vadd.f32 %v1240_v48, %v1203_v47  ;;  %v1035_v8 = vrot.slane %v3818_v40, 1  ;;  %3070 = vmatprep.mubr.msk.f32.mxu0 %vm1487_vm4, %v1853_v31  ;;  %v1174_v22 = vmul.f32 %v3421_v44, %v3818_v40  ;;  %v393_v40 = vpop.permute.xlu0 %392 }
  0xfe   : > { %v1408_v16 = vrot.slane %v1376_v5, 1  ;;  %v1309_v24 = vmul.f32 %v3472_v9, %v1271_v56  ;;  %v905_v54 = vrot.slane %v383_v46, 7  ;;  %v1034_v57 = vrot.slane %v383_v46, 1 }
  0xff   : > { %v1438_v27 = vsel %vm1045_vm1, %v1406_v21, %v1407_v55  ;;  %v1310_v38 = vmul.f32 %v3472_v9, %v1272_v7  ;;  %v1173_v1 = vmul.f32 %v3421_v44, %v383_v46  ;;  %v908_v61 = vrot.slane %v3855_v35, 7 }
 0x100   : > { %v1437_v58 = vsel %vm1045_vm1, %v1407_v55, %v1408_v16  ;;  %v1470_v26 = vmax.f32 %v1374_v10, %v1438_v27  ;;  %v1345_v25 = vadd.f32 %v3486_v18, %v1309_v24  ;;  %v926_v63 = vsel %vm916_vm0, %v905_v54, %v906_v14 }
 0x101   : > { %v1471_v36 = vmax.f32 %v1375_v0, %v1437_v58  ;;  %v3858_v37 = vadd.f32 %v3486_v18, %v1310_v38  ;;  %v927_v21 = vsel %vm916_vm0, %v904_v42, %v905_v54  ;;  %v1055_v23 = vsel %vm1045_vm1, %v1034_v57, %v1035_v8  ;;  %v3873_v33 = vld [vmem:[#allocation2 + $0x60] ss:$2 sm:$0xff] }
 0x102   : > { %1503 = vst.msk [vmem:[#allocation2 + $0x78] sm:$0xff] %vm1487_vm4, %v1470_v26  ;;  %v1377_v10 = vmax.f32 %v1345_v25, 0.0  ;;  %v1056_v13 = vsel %vm1045_vm1, %v1033_v50, %v1034_v57  ;;  %v1136_v49 = vmul.f32 %v3413_v41, %v927_v21  ;;  %v1137_v2 = vmul.f32 %v3413_v41, %v926_v63  ;;  %1899 = vrot.lane.b32.xlu0 %v3873_v33, %s3290_s28  ;;  %v3893_v57 = vpop.permute.xlu1 %407 }
 0x103   : > { %1504 = vst.msk [vmem:[#allocation2 + $0x80] sm:$0xff] %vm1487_vm4, %v1471_v36  ;;  %v1378_v42 = vmax.f32 %v3858_v37, 0.0  ;;  %v1241_v4 = vmul.f32 %v3449_v62, %v1056_v13  ;;  %v1242_v39 = vmul.f32 %v3449_v62, %v1055_v23  ;;  %v1037_v47 = vrot.slane %v3855_v35, 1  ;;  %v403_v36 = vpop.permute.xlu0 %402 }
 0x104   : > { %v1409_v50 = vrot.slane %v1377_v10, 1  ;;  %v1205_v12 = vadd.f32 %v1173_v1, %v1136_v49  ;;  %v1206_v0 = vadd.f32 %v1174_v22, %v1137_v2  ;;  %v1176_v56 = vmul.f32 %v3421_v44, %v3855_v35 }
 0x105   : > { %v1410_v48 = vrot.slane %v1378_v42, 1  ;;  %v1273_v46 = vadd.f32 %v1241_v4, %v1204_v3  ;;  %v907_v55 = vrot.slane %v393_v40, 7  ;;  %v1036_v24 = vrot.slane %v393_v40, 1 }
 0x106   : > { %v1436_v7 = vsel %vm1045_vm1, %v1408_v16, %v1409_v50  ;;  %v1274_v31 = vadd.f32 %v1242_v39, %v1205_v12  ;;  %v1175_v54 = vmul.f32 %v3421_v44, %v393_v40  ;;  %v1039_v2 = vrot.slane %v3893_v57, 1 }
 0x107   : > { %v1435_v27 = vsel %vm1045_vm1, %v1409_v50, %v1410_v48  ;;  %v1472_v38 = vmax.f32 %v1376_v5, %v1436_v7  ;;  %v1311_v22 = vmul.f32 %v3472_v9, %v1273_v46  ;;  %v924_v3 = vsel %vm916_vm0, %v907_v55, %v908_v61 }
 0x108   : > { %v1473_v1 = vmax.f32 %v1377_v10, %v1435_v27  ;;  %v1312_v58 = vmul.f32 %v3472_v9, %v1274_v31  ;;  %v925_v16 = vsel %vm916_vm0, %v906_v14, %v907_v55  ;;  %v1053_v26 = vsel %vm1045_vm1, %v1036_v24, %v1037_v47 }
 0x109   : > { %1505 = vst.msk [vmem:[#allocation2 + $0x88] sm:$0xff] %vm1487_vm4, %v1472_v38  ;;  %v1347_v5 = vadd.f32 %v3486_v18, %v1311_v22  ;;  %v1054_v25 = vsel %vm1045_vm1, %v1035_v8, %v1036_v24  ;;  %v1138_v63 = vmul.f32 %v3413_v41, %v925_v16  ;;  %v1139_v35 = vmul.f32 %v3413_v41, %v924_v3  ;;  %v3906_v37 = vld [vmem:[#allocation2 + $0x70] ss:$2 sm:$0xff]  ;;  %v3931_v3 = vpop.permute.xlu1 %417 }
 0x10a   : > { %1506 = vst.msk [vmem:[#allocation2 + $0x90] sm:$0xff] %vm1487_vm4, %v1473_v1  ;;  %v1348_v14 = vadd.f32 %v3486_v18, %v1312_v58  ;;  %v1243_v21 = vmul.f32 %v3449_v62, %v1054_v25  ;;  %v1244_v23 = vmul.f32 %v3449_v62, %v1053_v26  ;;  %v910_v10 = vrot.slane %v3893_v57, 7  ;;  %1901 = vrot.lane.b32.xlu1 %v3906_v37, %s3290_s28  ;;  %v413_v25 = vpop.permute.xlu0 %412 }
 0x10b   : > { %v1379_v8 = vmax.f32 %v1347_v5, 0.0  ;;  %v1207_v13 = vadd.f32 %v1175_v54, %v1138_v63  ;;  %v1208_v49 = vadd.f32 %v1176_v56, %v1139_v35  ;;  %v1178_v39 = vmul.f32 %v3421_v44, %v3893_v57 }
 0x10c   : > { %v1380_v40 = vmax.f32 %v1348_v14, 0.0  ;;  %v1275_v4 = vadd.f32 %v1243_v21, %v1206_v0  ;;  %v909_v50 = vrot.slane %v403_v36, 7  ;;  %v1038_v55 = vrot.slane %v403_v36, 1 }
 0x10d   : > { %v1411_v12 = vrot.slane %v1379_v8, 1  ;;  %v1276_v46 = vadd.f32 %v1244_v23, %v1207_v13  ;;  %v1177_v7 = vmul.f32 %v3421_v44, %v403_v36  ;;  %v912_v36 = vrot.slane %v3931_v3, 7 }
 0x10e   : > { %v1412_v31 = vrot.slane %v1380_v40, 1  ;;  %v1313_v24 = vmul.f32 %v3472_v9, %v1275_v4  ;;  %v922_v54 = vsel %vm916_vm0, %v909_v50, %v910_v10  ;;  %v923_v56 = vsel %vm916_vm0, %v908_v61, %v909_v50 }
 0x10f   : > { %v1434_v0 = vsel %vm1045_vm1, %v1410_v48, %v1411_v12  ;;  %v1314_v27 = vmul.f32 %v3472_v9, %v1276_v46  ;;  %v1051_v38 = vsel %vm1045_vm1, %v1038_v55, %v1039_v2  ;;  %v1052_v22 = vsel %vm1045_vm1, %v1037_v47, %v1038_v55 }
 0x110   : > { %v1433_v57 = vsel %vm1045_vm1, %v1411_v12, %v1412_v31  ;;  %v1474_v1 = vmax.f32 %v1378_v42, %v1434_v0  ;;  %v1349_v58 = vadd.f32 %v3486_v18, %v1313_v24  ;;  %v1140_v61 = vmul.f32 %v3413_v41, %v923_v56  ;;  %v3937_v16 = vld [vmem:[#allocation2 + $0x80] ss:$2 sm:$0xff] }
 0x111   : > { %v1475_v48 = vmax.f32 %v1379_v8, %v1433_v57  ;;  %v3940_v26 = vadd.f32 %v3486_v18, %v1314_v27  ;;  %v1141_v5 = vmul.f32 %v3413_v41, %v922_v54  ;;  %v1245_v47 = vmul.f32 %v3449_v62, %v1052_v22  ;;  %1903 = vrot.lane.b32.xlu0 %v3937_v16, %s3290_s28  ;;  %v428_v22 = vpop.permute.xlu1 %427 }
 0x112   : > { %1507 = vst.msk [vmem:[#allocation2 + $0x98] sm:$0xff] %vm1487_vm4, %v1474_v1  ;;  %v1381_v42 = vmax.f32 %v1349_v58, 0.0  ;;  %v1209_v63 = vadd.f32 %v1177_v7, %v1140_v61  ;;  %v1246_v35 = vmul.f32 %v3449_v62, %v1051_v38  ;;  %v1041_v8 = vrot.slane %v3931_v3, 1 }
 0x113   : > { %1508 = vst.msk [vmem:[#allocation2 + $0xa0] sm:$0xff] %vm1487_vm4, %v1475_v48  ;;  %v1382_v14 = vmax.f32 %v3940_v26, 0.0  ;;  %v1210_v21 = vadd.f32 %v1178_v39, %v1141_v5  ;;  %v1277_v23 = vadd.f32 %v1245_v47, %v1208_v49  ;;  %v1180_v50 = vmul.f32 %v3421_v44, %v3931_v3 }
 0x114   : > { %v1413_v13 = vrot.slane %v1381_v42, 1  ;;  %v1278_v4 = vadd.f32 %v1246_v35, %v1209_v63  ;;  %v911_v12 = vrot.slane %v413_v25, 7  ;;  %v1040_v7 = vrot.slane %v413_v25, 1 }
 0x115   : > { %v1414_v46 = vrot.slane %v1382_v14, 1  ;;  %v1315_v55 = vmul.f32 %v3472_v9, %v1277_v23  ;;  %v1179_v24 = vmul.f32 %v3421_v44, %v413_v25 }
 0x116   : > { %v1432_v54 = vsel %vm1045_vm1, %v1412_v31, %v1413_v13  ;;  %v1316_v39 = vmul.f32 %v3472_v9, %v1278_v4  ;;  %v920_v49 = vsel %vm916_vm0, %v911_v12, %v912_v36  ;;  %v921_v56 = vsel %vm916_vm0, %v910_v10, %v911_v12 }
 0x117   : > { %v1431_v0 = vsel %vm1045_vm1, %v1413_v13, %v1414_v46  ;;  %v1476_v27 = vmax.f32 %v1380_v40, %v1432_v54  ;;  %v1351_v38 = vadd.f32 %v3486_v18, %v1315_v55  ;;  %v1049_v31 = vsel %vm1045_vm1, %v1040_v7, %v1041_v8  ;;  %v423_v13 = vpop.permute.xlu0 %422 }
 0x118   : > { %v1477_v57 = vmax.f32 %v1381_v42, %v1431_v0  ;;  %v3973_v1 = vadd.f32 %v3486_v18, %v1316_v39  ;;  %v1050_v58 = vsel %vm1045_vm1, %v1039_v2, %v1040_v7  ;;  %v1142_v10 = vmul.f32 %v3413_v41, %v921_v56  ;;  %v3241_v56 = vld [vmem:[%s4625_s1 + $0x1] ss:$0 sm:$0xff] }
 0x119   : > { %1509 = vst.msk [vmem:[#allocation2 + $0xa8] sm:$0xff] %vm1487_vm4, %v1476_v27  ;;  %v1383_v40 = vmax.f32 %v1351_v38, 0.0  ;;  %v1143_v61 = vmul.f32 %v3413_v41, %v920_v49  ;;  %v1247_v48 = vmul.f32 %v3449_v62, %v1050_v58  ;;  %v1248_v26 = vmul.f32 %v3449_v62, %v1049_v31  ;;  %v3982_v5 = vld [vmem:[#allocation2 + $0x90] ss:$2 sm:$0xff]  ;;  %v3242_v58 = vld [vmem:[%s4625_s1 + $0x2] ss:$0 sm:$0xff] }
 0x11a   : > { %1510 = vst.msk [vmem:[#allocation2 + $0xb0] sm:$0xff] %vm1487_vm4, %v1477_v57  ;;  %v1384_v47 = vmax.f32 %v3973_v1, 0.0  ;;  %v1211_v25 = vadd.f32 %v1179_v24, %v1142_v10  ;;  %v914_v42 = vrot.slane %v428_v22, 7  ;;  %v1043_v2 = vrot.slane %v428_v22, 1  ;;  %1905 = vrot.lane.b32.xlu1 %v3982_v5, %s3290_s28 }
 0x11b   : > { %v1252_v41 = vmul.f32 %v3449_v62, %v1109_v20  ;;  %v1415_v63 = vrot.slane %v1383_v40, 1  ;;  %v1212_v35 = vadd.f32 %v1180_v50, %v1143_v61  ;;  %v1279_v23 = vadd.f32 %v1247_v48, %v1210_v21  ;;  %v3240_v20 = vld [vmem:[%s4625_s1] ss:$0 sm:$0xff] }
 0x11c   : > { %v1416_v4 = vrot.slane %v1384_v47, 1  ;;  %v1280_v12 = vadd.f32 %v1248_v26, %v1211_v25  ;;  %v917_v55 = vsel %vm916_vm0, %v914_v42, %v915_v59  ;;  %v1182_v7 = vmul.f32 %v3421_v44, %v428_v22 }
 0x11d   : > { %v1430_v52 = vsel %vm1045_vm1, %v1414_v46, %v1415_v63  ;;  %v1317_v6 = vmul.f32 %v3472_v9, %v1279_v23  ;;  %v1046_v62 = vsel %vm1045_vm1, %v1043_v2, %v1044_v60  ;;  %v1146_v21 = vmul.f32 %v3240_v20, %v917_v55 }
 0x11e   : > { %v1429_v59 = vsel %vm1045_vm1, %v1415_v63, %v1416_v4  ;;  %v1478_v50 = vmax.f32 %v1382_v14, %v1430_v52  ;;  %v1318_v44 = vmul.f32 %v3472_v9, %v1280_v12  ;;  %v913_v24 = vrot.slane %v423_v13, 7 }
 0x11f   : > { %v1479_v46 = vmax.f32 %v1383_v40, %v1429_v59  ;;  %v1353_v54 = vadd.f32 %v3486_v18, %v1317_v6  ;;  %v1215_v53 = vadd.f32 %v3481_v17, %v1146_v21  ;;  %v1042_v39 = vrot.slane %v423_v13, 1 }
 0x120   : > { %1511 = vst.msk [vmem:[#allocation2 + $0xb8] sm:$0xff] %vm1487_vm4, %v1478_v50  ;;  %v4015_v60 = vadd.f32 %v3486_v18, %v1318_v44  ;;  %v918_v49 = vsel %vm916_vm0, %v913_v24, %v914_v42  ;;  %v919_v14 = vsel %vm916_vm0, %v912_v36, %v913_v24  ;;  %v1181_v0 = vmul.f32 %v3241_v56, %v423_v13  ;;  %v4026_v17 = vld [vmem:[#allocation2 + $0xa0] ss:$2 sm:$0xff]  ;;  %v1953_v24 = vld [vmem:[#allocation3 + $0x10] sm:$0xff] }
 0x121   : > { %1512 = vst.msk [vmem:[#allocation2 + $0xc0] sm:$0xff] %vm1487_vm4, %v1479_v46  ;;  %v1385_v27 = vmax.f32 %v1353_v54, 0.0  ;;  %v1284_v38 = vadd.f32 %v1252_v41, %v1215_v53  ;;  %v1047_v31 = vsel %vm1045_vm1, %v1042_v39, %v1043_v2  ;;  %v1048_v22 = vsel %vm1045_vm1, %v1041_v8, %v1042_v39  ;;  %1907 = vrot.lane.b32.xlu0 %v4026_v17, %s3290_s28  ;;  %v1954_v46 = vld [vmem:[#allocation3 + $0x18] sm:$0xff] }
 0x122   : > { %v1386_v36 = vmax.f32 %v4015_v60, 0.0  ;;  %v1144_v57 = vmul.f32 %v3240_v20, %v919_v14  ;;  %v1145_v1 = vmul.f32 %v3240_v20, %v918_v49  ;;  %v1249_v10 = vmul.f32 %v3242_v58, %v1048_v22  ;;  %v3244_v20 = vld [vmem:[%s4628_s4] ss:$0 sm:$0xff] }
 0x123   : > { %v1417_v40 = vrot.slane %v1385_v27, 1  ;;  %v1251_v61 = vmul.f32 %v3242_v58, %v1046_v62  ;;  %v1322_v48 = vmul.f32 %v3472_v9, %v1284_v38  ;;  %v1250_v3 = vmul.f32 %v3242_v58, %v1047_v31  ;;  %v3243_v9 = vld [vmem:[%s4627_s3] ss:$0 sm:$0xff]  ;;  %v1952_v62 = vld [vmem:[#allocation3 + $0x8] sm:$0xff] }
 0x124   : > { %v1418_v26 = vrot.slane %v1386_v36, 1  ;;  %v1213_v25 = vadd.f32 %v1181_v0, %v1144_v57  ;;  %v1214_v8 = vadd.f32 %v1182_v7, %v1145_v1  ;;  %v1281_v42 = vadd.f32 %v1249_v10, %v1212_v35  ;;  %v1951_v35 = vld [vmem:[#allocation3] sm:$0xff] }
 0x125   : > { %v1428_v2 = vsel %vm1045_vm1, %v1416_v4, %v1417_v40  ;;  %v1358_v41 = vadd.f32 %v3486_v18, %v1322_v48  ;;  %v3107_v44 = vpack.c.bf16 %v1952_v62, %v1951_v35  ;;  %v3291_v39 = vmov 0.0|0.0   ;;  %v1955_v31 = vld [vmem:[#allocation3 + $0x20] sm:$0xff]  ;;  %v1962_v62 = vld [vmem:[#allocation3 + $0x58] sm:$0xff] }
 0x126   : > { %v1427_v63 = vsel %vm1045_vm1, %v1417_v40, %v1418_v26  ;;  %v1480_v23 = vmax.f32 %v1384_v47, %v1428_v2  ;;  %v1282_v13 = vadd.f32 %v1250_v3, %v1213_v25  ;;  %v1283_v12 = vadd.f32 %v1251_v61, %v1214_v8  ;;  %3106 = vmatprep.subr.bf16.mxu0 %v3291_v39  ;;  %v1957_v25 = vld [vmem:[#allocation3 + $0x30] sm:$0xff]  ;;  %v1958_v8 = vld [vmem:[#allocation3 + $0x38] sm:$0xff] }
 0x127   : > { %v1481_v55 = vmax.f32 %v1385_v27, %v1427_v63  ;;  %v1390_v52 = vmax.f32 %v1358_v41, 0.0  ;;  %v1319_v6 = vmul.f32 %v3243_v9, %v1281_v42  ;;  %v4050_v7 = vld [vmem:[#allocation2 + $0xb0] ss:$2 sm:$0xff]  ;;  %3142 = vmatprep.subr.bf16.mxu1 %v3291_v39  ;;  %3108 = vmatpush1.bf16.msra.mxu0 %v3107_v44  ;;  %v3110_v0 = vpack.c.bf16 %v1954_v46, %v1953_v24  ;;  %v1959_v41 = vld [vmem:[#allocation3 + $0x40] sm:$0xff]  ;;  %v1960_v63 = vld [vmem:[#allocation3 + $0x48] sm:$0xff] }
 0x128   : > { %1513 = vst.msk [vmem:[#allocation2 + $0xc8] sm:$0xff] %vm1487_vm4, %v1480_v23  ;;  %v1320_v18 = vmul.f32 %v3243_v9, %v1282_v13  ;;  %v1321_v4 = vmul.f32 %v3243_v9, %v1283_v12  ;;  %1909 = vrot.lane.b32.xlu1 %v4050_v7, %s3290_s28  ;;  %3109 = vmatprep.subr.bf16.mxu0 %v3291_v39  ;;  %v1831_v2 = vrot.slane %v3937_v16, 1  ;;  %v1833_v23 = vrot.slane %v4026_v17, 1  ;;  %v1961_v13 = vld [vmem:[#allocation3 + $0x50] sm:$0xff] }
 0x129   : > { %1514 = vst.msk [vmem:[#allocation2 + $0xd0] sm:$0xff] %vm1487_vm4, %v1481_v55  ;;  %v1422_v47 = vrot.slane %v1390_v52, 1  ;;  %v1355_v21 = vadd.f32 %v3244_v20, %v1319_v6  ;;  %v3116_v42 = vpack.c.bf16 %v1958_v8, %v1957_v25  ;;  %v1767_v55 = vrot.slane %v3937_v16, 7  ;;  %v1969_v8 = vld [vmem:[#allocation3 + $0x90] sm:$0xff] }
 0x12a   : > { %v1356_v59 = vadd.f32 %v3244_v20, %v1320_v18  ;;  %v1357_v50 = vadd.f32 %v3244_v20, %v1321_v4  ;;  %v1834_v9 = vrot.slane %v4050_v7, 1  ;;  %v3119_v35 = vpack.c.bf16 %v1960_v63, %v1959_v41  ;;  %v1971_v41 = vld [vmem:[#allocation3 + $0xa0] sm:$0xff]  ;;  %v1972_v63 = vld [vmem:[#allocation3 + $0xa8] sm:$0xff] }
 0x12b   : > { %v1454_v54 = vsel %vm1045_vm1, %v1422_v47, %v3536_v19  ;;  %v1387_v53 = vmax.f32 %v1355_v21, 0.0  ;;  %v1956_v19 = vld [vmem:[#allocation3 + $0x28] sm:$0xff]  ;;  %3111 = vmatpush1.bf16.msra.mxu0 %v3110_v0  ;;  %v1769_v18 = vrot.slane %v4026_v17, 7  ;;  %v1770_v21 = vrot.slane %v4050_v7, 7 }
 0x12c   : > { %v1486_v60 = vmax.f32 %v1390_v52, %v1454_v54  ;;  %v1388_v49 = vmax.f32 %v1356_v59, 0.0  ;;  %v1389_v14 = vmax.f32 %v1357_v50, 0.0  ;;  %3112 = vmatprep.subr.bf16.mxu0 %v3291_v39  ;;  %v1768_v52 = vrot.slane %v3982_v5, 7 }
 0x12d   : > { %v1419_v56 = vrot.slane %v1387_v53, 1 }
 0x12e   : > { %1519 = vst.msk [vmem:[#allocation2 + $0xf8] sm:$0xff] %vm1487_vm4, %v1486_v60  ;;  %v1420_v27 = vrot.slane %v1388_v49, 1  ;;  %v1421_v38 = vrot.slane %v1389_v14, 1  ;;  %v4115_v7 = vsel %vm916_vm0, %v1767_v55, %v1768_v52  ;;  %v4119_v60 = vsel %vm1045_vm1, %v1833_v23, %v1834_v9 }
 0x12f   : > { %v1426_v22 = vsel %vm1045_vm1, %v1418_v26, %v1419_v56  ;;  %v4068_v57 = vld [vmem:[#allocation2 + $0xc0] ss:$2 sm:$0xff]  ;;  %v3113_v26 = vpack.c.bf16 %v1956_v19, %v1955_v31 }
 0x130   : > { %v1423_v1 = vsel %vm1045_vm1, %v1421_v38, %v1422_v47  ;;  %v1424_v58 = vsel %vm1045_vm1, %v1420_v27, %v1421_v38  ;;  %v1425_v10 = vsel %vm1045_vm1, %v1419_v56, %v1420_v27  ;;  %v1482_v40 = vmax.f32 %v1386_v36, %v1426_v22  ;;  %1911 = vrot.lane.b32.xlu0 %v4068_v57, %s3290_s28 }
 0x131   : > { %v1483_v61 = vmax.f32 %v1387_v53, %v1425_v10  ;;  %v1484_v48 = vmax.f32 %v1388_v49, %v1424_v58  ;;  %v1485_v3 = vmax.f32 %v1389_v14, %v1423_v1  ;;  %v1832_v36 = vrot.slane %v3982_v5, 1  ;;  %3114 = vmatpush1.bf16.msra.mxu0 %v3113_v26  ;;  %v1963_v49 = vld [vmem:[#allocation3 + $0x60] sm:$0xff]  ;;  %v1964_v14 = vld [vmem:[#allocation3 + $0x68] sm:$0xff] }
 0x132   : > { %1515 = vst.msk [vmem:[#allocation2 + $0xd8] sm:$0xff] %vm1487_vm4, %v1482_v40  ;;  %3115 = vmatprep.subr.bf16.mxu0 %v3291_v39  ;;  %v1835_v4 = vrot.slane %v4068_v57, 1  ;;  %v1771_v5 = vrot.slane %v4068_v57, 7  ;;  %v3122_v53 = vpack.c.bf16 %v1962_v62, %v1961_v13  ;;  %v4126_v56 = vsel %vm916_vm0, %v1768_v52, %v1769_v18  ;;  %v1965_v40 = vld [vmem:[#allocation3 + $0x70] sm:$0xff]  ;;  %v1968_v26 = vld [vmem:[#allocation3 + $0x88] sm:$0xff] }
 0x133   : > { %1516 = vst.msk [vmem:[#allocation2 + $0xe0] sm:$0xff] %vm1487_vm4, %v1483_v61  ;;  %1517 = vst.msk [vmem:[#allocation2 + $0xe8] sm:$0xff] %vm1487_vm4, %v1484_v48  ;;  %v4091_v12 = vsel %vm1045_vm1, %v1831_v2, %v1832_v36  ;;  %v4108_v46 = vsel %vm1045_vm1, %v1832_v36, %v1833_v23  ;;  %v4134_v27 = vsel %vm916_vm0, %v1769_v18, %v1770_v21  ;;  %v1966_v61 = vld [vmem:[#allocation3 + $0x78] sm:$0xff]  ;;  %v1555_v13 = vand.u32 63, %v3405_v34  ;;  %v1973_v52 = vld [vmem:[#allocation3 + $0xb0] sm:$0xff] }
 0x134   : > { %1518 = vst.msk [vmem:[#allocation2 + $0xf0] sm:$0xff] %vm1487_vm4, %v1485_v3  ;;  %v4130_v0 = vsel %vm1045_vm1, %v1834_v9, %v1835_v4  ;;  %v4142_v31 = vsel %vm916_vm0, %v1770_v21, %v1771_v5  ;;  %v3125_v58 = vpack.c.bf16 %v1964_v14, %v1963_v49  ;;  %v3128_v48 = vpack.c.bf16 %v1966_v61, %v1965_v40  ;;  %v1967_v3 = vld [vmem:[#allocation3 + $0x80] sm:$0xff]  ;;  %v1970_v36 = vld [vmem:[#allocation3 + $0x98] sm:$0xff] }
 0x135   : > { %3117 = vmatpush1.bf16.msra.mxu0 %v3116_v42  ;;  %v3131_v25 = vpack.c.bf16 %v1968_v26, %v1967_v3  ;;  %v3134_v42 = vpack.c.bf16 %v1970_v36, %v1969_v8  ;;  %v3137_v23 = vpack.c.bf16 %v1972_v63, %v1971_v41  ;;  %v1974_v9 = vld [vmem:[#allocation3 + $0xb8] sm:$0xff]  ;;  %vm1743_vm7 = vcmp.eq.s32.totalorder %v1555_v13, 0 }
 0x136   : > { %3118 = vmatprep.subr.bf16.mxu0 %v3291_v39  ;;  %v3140_v62 = vpack.c.bf16 %v1974_v9, %v1973_v52  ;;  %v1825_v21 = vrot.slane %v3701_v30, 1  ;;  %v1762_v40 = vrot.slane %v3741_v29, 7  ;;  %v1828_v26 = vrot.slane %v3820_v28, 1 }
 0x137   : > { %v1829_v41 = vrot.slane %v3873_v33, 1  ;;  %v1764_v63 = vrot.slane %v3820_v28, 7  ;;  %v1830_v9 = vrot.slane %v3906_v37, 1 }
 0x139   : > { %v1546_v6 = vld [vmem:[#allocation2 + $0xd0] ss:$2 sm:$0xff]  ;;  %3120 = vmatpush1.bf16.msra.mxu0 %v3119_v35 }
 0x13a   : > { %1913 = vrot.lane.b32.xlu1 %v1546_v6, %s3290_s28  ;;  %v1548_v47 = vld [vmem:[#allocation2 + $0xe0] ss:$2 sm:$0xff]  ;;  %v1836_v59 = vrot.slane %v1546_v6, 1  ;;  %v1772_v44 = vrot.slane %v1546_v6, 7  ;;  %3121 = vmatprep.subr.bf16.mxu0 %v3291_v39 }
 0x13b   : > { %v4099_v20 = vld [vmem:[#allocation2 + $0xf0] ss:$2 sm:$0xff]  ;;  %1915 = vrot.lane.b32.xlu0 %v1548_v47, %s3290_s28  ;;  %v1837_v50 = vrot.slane %v1548_v47, 1  ;;  %v1773_v24 = vrot.slane %v1548_v47, 7  ;;  %v3245_v6 = vld [vmem:[#allocation2] ss:$2 sm:$0xff] }
 0x13c   : > { %v1838_v17 = vrot.slane %v4099_v20, 1  ;;  %v1774_v54 = vrot.slane %v4099_v20, 7  ;;  %v4138_v38 = vsel %vm1045_vm1, %v1835_v4, %v1836_v59  ;;  %v4150_v22 = vsel %vm916_vm0, %v1771_v5, %v1772_v44 }
 0x13d   : > { %v4146_v19 = vsel %vm1045_vm1, %v1836_v59, %v1837_v50  ;;  %v4160_v1 = vsel %vm916_vm0, %v1772_v44, %v1773_v24  ;;  %3123 = vmatpush1.bf16.msra.mxu0 %v3122_v53  ;;  %v1759_v35 = vrot.slane %v3245_v6, 7  ;;  %v1760_v5 = vrot.slane %v3638_v32, 7 }
 0x13e   : > { %1917 = vrot.lane.b32.xlu1 %v4099_v20, %s3290_s28  ;;  %v4156_v57 = vsel %vm1045_vm1, %v1837_v50, %v1838_v17  ;;  %v4164_v10 = vsel %vm916_vm0, %v1773_v24, %v1774_v54  ;;  %3124 = vmatprep.subr.bf16.mxu0 %v3291_v39  ;;  %v1852_v44 = vsel %vm1045_vm1, %v1824_v11, %v1825_v21  ;;  %v1761_v53 = vrot.slane %v3701_v30, 7  ;;  %v2502_v20 = vld [vmem:[#allocation3 + $0xd8] sm:$0xff] }
 0x13f   : > { %v1790_v18 = vsel %vm916_vm0, %v1774_v54, %v1759_v35  ;;  %v1789_v24 = vsel %vm916_vm0, %v1759_v35, %v1760_v5  ;;  %v1826_v54 = vrot.slane %v3741_v29, 1  ;;  %v1827_v11 = vrot.slane %v3783_v45, 1 }
 0x140   : > { %v1791_v47 = vsel %vm1743_vm7, 0.0, %v1790_v18  ;;  %v1788_v32 = vsel %vm916_vm0, %v1760_v5, %v1761_v53  ;;  %v1787_v3 = vsel %vm916_vm0, %v1761_v53, %v1762_v40  ;;  %v4218_v6 = vadd.s32 56, %v3405_v34 }
 0x141   : > { %3126 = vmatpush1.bf16.msra.mxu0 %v3125_v58  ;;  %v1851_v58 = vsel %vm1045_vm1, %v1825_v21, %v1826_v54  ;;  %v1849_v36 = vsel %vm1045_vm1, %v1827_v11, %v1828_v26  ;;  %v1847_v35 = vsel %vm1045_vm1, %v1829_v41, %v1830_v9  ;;  %v1765_v18 = vrot.slane %v3873_v33, 7 }
 0x142   : > { %3127 = vmatprep.subr.bf16.mxu0 %v3291_v39  ;;  %v444_v33 = vadd.s32 64, %v3405_v34 }
 0x143   : > { %v1784_v21 = vsel %vm916_vm0, %v1764_v63, %v1765_v18 }
 0x145   : > { %3129 = vmatpush1.bf16.msra.mxu0 %v3128_v48  ;;  %v1850_v48 = vsel %vm1045_vm1, %v1826_v54, %v1827_v11  ;;  %v1611_v54 = vand.u32 63, %v444_v33 }
 0x146   : > { %3130 = vmatprep.subr.bf16.mxu0 %v3291_v39 }
 0x147   : > { %v1888_v4 = vpop.permute.xlu0 %1887  ;;  %vm1751_vm9 = vcmp.eq.s32.totalorder %v1611_v54, 0 }
 0x148   : > { %v1935_v59 = vsel %vm1487_vm4, %v1791_v47, %v1888_v4  ;;  %v1846_v4 = vsel %vm1045_vm1, %v1830_v9, %v1831_v2  ;;  %v2512_v9 = vld [vmem:[#allocation3 + $0x128] sm:$0xff] }
 0x149   : > { %3132 = vmatpush1.bf16.msra.mxu0 %v3131_v25  ;;  %v1763_v25 = vrot.slane %v3783_v45, 7 }
 0x14a   : > { %3133 = vmatprep.subr.bf16.mxu0 %v3291_v39 }
 0x14b   : > { %v1785_v52 = vsel %vm916_vm0, %v1763_v25, %v1764_v63  ;;  %v4293_v63 = vld [vmem:[%s4628_s4 + $0x1] ss:$0 sm:$0xff] }
 0x14d   : > { %3135 = vmatpush1.bf16.msra.mxu0 %v3134_v42  ;;  %v1890_v50 = vpop.permute.xlu1 %1889  ;;  %v1786_v42 = vsel %vm916_vm0, %v1762_v40, %v1763_v25  ;;  %v2500_v40 = vld [vmem:[#allocation3 + $0xc8] sm:$0xff] }
 0x14e   : > { %3136 = vmatprep.subr.bf16.mxu0 %v3291_v39  ;;  %v1936_v49 = vsel %vm1487_vm4, %v1789_v24, %v1890_v50  ;;  %v1766_v50 = vrot.slane %v3906_v37, 7  ;;  %v2508_v25 = vld [vmem:[#allocation3 + $0x108] sm:$0xff] }
 0x150   : > { %v1783_v24 = vsel %vm916_vm0, %v1765_v18, %v1766_v50  ;;  %v1782_v53 = vsel %vm916_vm0, %v1766_v50, %v1767_v55 }
 0x151   : > { %3138 = vmatpush1.bf16.msra.mxu0 %v3137_v23  ;;  %v1848_v23 = vsel %vm1045_vm1, %v1828_v26, %v1829_v41  ;;  %v2507_v26 = vld [vmem:[#allocation3 + $0x100] sm:$0xff] }
 0x152   : > { %3139 = vmatprep.subr.bf16.mxu0 %v3291_v39 }
 0x155   : > { %3141 = vmatpush1.bf16.msra.mxu0 %v3140_v62  ;;  %v1604_v62 = vand.u32 63, %v4218_v6 }
 0x156   : > { %v1892_v14 = vpop.permute.xlu0 %1891 }
 0x157   : > { %v1937_v30 = vsel %vm1487_vm4, %v1788_v32, %v1892_v14  ;;  %vm1814_vm8 = vcmp.eq.s32.totalorder %v1604_v62, 63 }
 0x158   : > { %2088 = vmatmul.mubr.f32.vlgmr.msra.gmra.mrb[0].mxu0 %v1935_v59  ;;  %v1862_v59 = vsel %vm1814_vm8, 0.0, %v1846_v4 }
 0x159   : > { %3071 = vmatprep.mubr.msk.f32.mxu0 %vm1487_vm4, %v1852_v44 }
 0x15c   : > { %2093 = vmatmul.mubr.f32.gmra.mrb[2].mxu0 %v1936_v49  ;;  %v1799_v49 = vsel %vm1751_vm9, 0.0, %v1782_v53  ;;  %v2516_v53 = vld [vmem:[#allocation3 + $0x148] sm:$0xff] }
 0x15d   : > { %3072 = vmatprep.mubr.msk.f32.mxu0 %vm1487_vm4, %v1851_v58  ;;  %v1894_v61 = vpop.permute.xlu1 %1893 }
 0x15e   : > { %v1938_v29 = vsel %vm1487_vm4, %v1787_v3, %v1894_v61  ;;  %v3146_v61 = vpack.c.bf16 %v2502_v20, %v2501_v51  ;;  %v2506_v3 = vld [vmem:[#allocation3 + $0xf8] sm:$0xff]  ;;  %v2520_v51 = vld [vmem:[#allocation3 + $0x168] sm:$0xff] }
 0x160   : > { %2098 = vmatmul.mubr.f32.gmra.mrb[4].mxu0 %v1937_v30 }
 0x161   : > { %3073 = vmatprep.mubr.msk.f32.mxu0 %vm1487_vm4, %v1850_v48  ;;  %v2505_v48 = vld [vmem:[#allocation3 + $0xf0] sm:$0xff] }
 0x164   : > { %2103 = vmatmul.mubr.f32.gmra.mrb[6].mxu0 %v1938_v29  ;;  %v3155_v29 = vpack.c.bf16 %v2508_v25, %v2507_v26  ;;  %v2521_v26 = vld [vmem:[#allocation3 + $0x170] sm:$0xff]  ;;  %v2522_v25 = vld [vmem:[#allocation3 + $0x178] sm:$0xff] }
 0x165   : > { %v1896_v8 = vpop.permute.xlu0 %1895  ;;  %3074 = vmatprep.mubr.msk.f32.mxu0 %vm1487_vm4, %v1849_v36  ;;  %v2509_v36 = vld [vmem:[#allocation3 + $0x110] sm:$0xff] }
 0x166   : > { %v1939_v45 = vsel %vm1487_vm4, %v1786_v42, %v1896_v8  ;;  %v4287_v8 = vld [vmem:[%s4627_s3 + $0x1] ss:$0 sm:$0xff]  ;;  %v2510_v42 = vld [vmem:[#allocation3 + $0x118] sm:$0xff] }
 0x168   : > { %2108 = vmatmul.mubr.f32.gmra.mrb[8].mxu0 %v1939_v45 }
 0x169   : > { %3075 = vmatprep.mubr.msk.f32.mxu0 %vm1487_vm4, %v1848_v23 }
 0x16c   : > { %v1898_v13 = vpop.permute.xlu1 %1897 }
 0x16d   : > { %v1940_v28 = vsel %vm1487_vm4, %v1785_v52, %v1898_v13  ;;  %v3158_v13 = vpack.c.bf16 %v2510_v42, %v2509_v36  ;;  %v2511_v52 = vld [vmem:[#allocation3 + $0x120] sm:$0xff] }
 0x16e   : > { %2113 = vmatmul.mubr.f32.gmra.mrb[10].mxu0 %v1940_v28  ;;  %v3161_v4 = vpack.c.bf16 %v2512_v9, %v2511_v52 }
 0x16f   : > { %3076 = vmatprep.mubr.msk.f32.mxu0 %vm1487_vm4, %v1847_v35 }
 0x174   : > { %v1900_v47 = vpop.permute.xlu0 %1899 }
 0x175   : > { %v1941_v5 = vsel %vm1487_vm4, %v1784_v21, %v1900_v47  ;;  %v2513_v47 = vld [vmem:[#allocation3 + $0x130] sm:$0xff]  ;;  %v2514_v21 = vld [vmem:[#allocation3 + $0x138] sm:$0xff] }
 0x176   : > { %2118 = vmatmul.mubr.f32.gmra.mrb[12].mxu0 %v1941_v5  ;;  %v3164_v54 = vpack.c.bf16 %v2514_v21, %v2513_v47 }
 0x177   : > { %3077 = vmatprep.mubr.msk.f32.mxu0 %vm1487_vm4, %v1862_v59 }
 0x17c   : > { %v1902_v44 = vpop.permute.xlu1 %1901 }
 0x17d   : > { %v1942_v2 = vsel %vm1487_vm4, %v1783_v24, %v1902_v44 }
 0x17e   : > { %2123 = vmatmul.mubr.f32.gmra.mrb[14].mxu0 %v1942_v2  ;;  %v2515_v2 = vld [vmem:[#allocation3 + $0x140] sm:$0xff] }
 0x17f   : > { %3078 = vmatprep.mubr.msk.f32.mxu0 %vm1487_vm4, %v4091_v12 }
 0x183   : > { %v1904_v37 = vpop.permute.xlu0 %1903 }
 0x184   : > { %v1943_v14 = vsel %vm1487_vm4, %v1799_v49, %v1904_v37 }
 0x185   : > { %2128 = vmatmul.mubr.f32.gmra.mrb[16].mxu0 %v1943_v14 }
 0x186   : > { %3079 = vmatprep.mubr.msk.f32.mxu0 %vm1487_vm4, %v4108_v46 }
 0x18c   : > { %v1906_v58 = vpop.permute.xlu1 %1905 }
 0x18d   : > { %v1944_v32 = vsel %vm1487_vm4, %v4115_v7, %v1906_v58 }
 0x18e   : > { %2133 = vmatmul.mubr.f32.gmra.mrb[18].mxu0 %v1944_v32 }
 0x18f   : > { %3080 = vmatprep.mubr.msk.f32.mxu0 %vm1487_vm4, %v4119_v60 }
 0x193   : > { %v1908_v16 = vpop.permute.xlu0 %1907 }
 0x194   : > { %v1945_v12 = vsel %vm1487_vm4, %v4126_v56, %v1908_v16  ;;  %v1660_v56 = vand.u32 63, %v3416_v43 }
 0x195   : > { %2138 = vmatmul.mubr.f32.gmra.mrb[20].mxu0 %v1945_v12 }
 0x196   : > { %3081 = vmatprep.mubr.msk.f32.mxu0 %vm1487_vm4, %v4130_v0  ;;  %vm1822_vm10 = vcmp.eq.s32.totalorder %v1660_v56, 63  ;;  %v2518_v56 = vld [vmem:[#allocation3 + $0x158] sm:$0xff] }
 0x19a   : > { %v1910_v55 = vpop.permute.xlu1 %1909 }
 0x19b   : > { %v1946_v46 = vsel %vm1487_vm4, %v4134_v27, %v1910_v55 }
 0x19c   : > { %2143 = vmatmul.mubr.f32.gmra.mrb[22].mxu0 %v1946_v46  ;;  %v3167_v46 = vpack.c.bf16 %v2516_v53, %v2515_v2 }
 0x19d   : > { %3082 = vmatprep.mubr.msk.f32.mxu0 %vm1487_vm4, %v4138_v38  ;;  %v1854_v38 = vsel %vm1045_vm1, %v1838_v17, %v1823_v15  ;;  %v2503_v15 = vld [vmem:[#allocation3 + $0xe0] sm:$0xff]  ;;  %v2504_v17 = vld [vmem:[#allocation3 + $0xe8] sm:$0xff] }
 0x1a2   : > { %v1912_v7 = vpop.permute.xlu0 %1911 }
 0x1a3   : > { %v1947_v60 = vsel %vm1487_vm4, %v4142_v31, %v1912_v7 }
 0x1a4   : > { %2148 = vmatmul.mubr.f32.gmra.mrb[24].mxu0 %v1947_v60  ;;  %v2517_v60 = vld [vmem:[#allocation3 + $0x150] sm:$0xff] }
 0x1a5   : > { %3083 = vmatprep.mubr.msk.f32.mxu0 %vm1487_vm4, %v4146_v19  ;;  %v1870_v19 = vsel %vm1822_vm10, 0.0, %v1854_v38 }
 0x1ac   : > { %v1914_v11 = vpop.permute.xlu1 %1913 }
 0x1ad   : > { %v1948_v0 = vsel %vm1487_vm4, %v4150_v22, %v1914_v11  ;;  %v1916_v27 = vpop.permute.xlu0 %1915 }
 0x1ae   : > { %2153 = vmatmul.mubr.f32.gmra.mrb[26].mxu0 %v1948_v0  ;;  %v1949_v43 = vsel %vm1487_vm4, %v4160_v1, %v1916_v27  ;;  %v3149_v1 = vpack.c.bf16 %v2504_v17, %v2503_v15 }
 0x1af   : > { %3084 = vmatprep.mubr.msk.f32.mxu0 %vm1487_vm4, %v4156_v57  ;;  %v2499_v57 = vld [vmem:[#allocation3 + $0xc0] sm:$0xff] }
 0x1b0   : > { %v1918_v31 = vpop.permute.xlu1 %1917  ;;  %v3143_v30 = vpack.c.bf16 %v2500_v40, %v2499_v57  ;;  %v2519_v40 = vld [vmem:[#allocation3 + $0x160] sm:$0xff] }
 0x1b1   : > { %v1950_v22 = vsel %vm1487_vm4, %v4164_v10, %v1918_v31  ;;  %v3152_v10 = vpack.c.bf16 %v2506_v3, %v2505_v48  ;;  %v3173_v3 = vpack.c.bf16 %v2520_v51, %v2519_v40 }
 0x1b2   : > { %2158 = vmatmul.mubr.f32.gmra.mrb[28].mxu0 %v1949_v43  ;;  %3144 = vmatpush1.bf16.msra.mxu1 %v3143_v30 }
 0x1b3   : > { %3085 = vmatprep.mubr.msk.f32.mxu0 %vm1487_vm4, %v1870_v19  ;;  %3145 = vmatprep.subr.bf16.mxu1 %v3291_v39 }
 0x1b6   : > { %2163 = vmatmul.mubr.f32.gmra.mrb[30].mxu0 %v1950_v22  ;;  %3147 = vmatpush1.bf16.msra.mxu1 %v3146_v61  ;;  %v3170_v22 = vpack.c.bf16 %v2518_v56, %v2517_v60 }
 0x1b7   : > { %3148 = vmatprep.subr.bf16.mxu1 %v3291_v39 }
 0x1ba   : > { %3150 = vmatpush1.bf16.msra.mxu1 %v3149_v1 }
 0x1bb   : > { %3151 = vmatprep.subr.bf16.mxu1 %v3291_v39 }
 0x1be   : > { %3153 = vmatpush1.bf16.msra.mxu1 %v3152_v10 }
 0x1bf   : > { %3154 = vmatprep.subr.bf16.mxu1 %v3291_v39 }
 0x1c2   : > { %3156 = vmatpush1.bf16.msra.mxu1 %v3155_v29 }
 0x1c3   : > { %3157 = vmatprep.subr.bf16.mxu1 %v3291_v39 }
 0x1c6   : > { %3159 = vmatpush1.bf16.msra.mxu1 %v3158_v13 }
 0x1c7   : > { %3160 = vmatprep.subr.bf16.mxu1 %v3291_v39 }
 0x1ca   : > { %3162 = vmatpush1.bf16.msra.mxu1 %v3161_v4 }
 0x1cb   : > { %3163 = vmatprep.subr.bf16.mxu1 %v3291_v39 }
 0x1ce   : > { %3165 = vmatpush1.bf16.msra.mxu1 %v3164_v54 }
 0x1cf   : > { %3166 = vmatprep.subr.bf16.mxu1 %v3291_v39 }
 0x1d2   : > { %3168 = vmatpush1.bf16.msra.mxu1 %v3167_v46 }
 0x1d3   : > { %3169 = vmatprep.subr.bf16.mxu1 %v3291_v39 }
 0x1d6   : > { %3171 = vmatpush1.bf16.msra.mxu1 %v3170_v22 }
 0x1d7   : > { %3172 = vmatprep.subr.bf16.mxu1 %v3291_v39 }
 0x1da   : > { %3174 = vmatpush1.bf16.msra.mxu1 %v3173_v3 }
 0x1db   : > { %3175 = vmatprep.subr.bf16.mxu1 %v3291_v39 }
 0x22b   : > { %v2089_v41 = vpop.f32.mrb[0].mxu0 }
 0x22c   : > { %v2174_v45 = vmul.f32 %v4287_v8, %v2089_v41  ;;  %v2091_v23 = vpop.f32.mrb[1].mxu0 }
 0x22e   : > { %v2194_v28 = vadd.f32 %v4293_v63, %v2174_v45  ;;  %v3176_v45 = vpack.c.bf16 %v2522_v25, %v2521_v26 }
 0x22f   : > { %v2094_v35 = vpop.f32.mrb[2].mxu0 }
 0x230   : > { %v2175_v62 = vmul.f32 %v4287_v8, %v2094_v35  ;;  %v2096_v18 = vpop.f32.mrb[3].mxu0  ;;  %v2210_v5 = vmax.f32 %v2194_v28, 0.0  ;;  %3177 = vmatpush1.bf16.msra.mxu1 %v3176_v45 }
 0x231   : > { %3178 = vmatprep.subr.bf16.mxu1 %v3291_v39 }
 0x232   : > { %v2195_v59 = vadd.f32 %v4293_v63, %v2175_v62  ;;  %v4303_v37 = vrot.slane %v2210_v5, 1 }
 0x233   : > { %v2099_v50 = vpop.f32.mrb[4].mxu0 }
 0x234   : > { %v2211_v33 = vmax.f32 %v2195_v59, 0.0  ;;  %v2176_v44 = vmul.f32 %v4287_v8, %v2099_v50  ;;  %v2101_v24 = vpop.f32.mrb[5].mxu0 }
 0x236   : > { %v2227_v49 = vrot.slane %v2211_v33, 1  ;;  %v2196_v14 = vadd.f32 %v4293_v63, %v2176_v44 }
 0x237   : > { %v2104_v58 = vpop.f32.mrb[6].mxu0 }
 0x238   : > { %v2256_v32 = vsel %vm1045_vm1, %v4303_v37, %v2227_v49  ;;  %v2212_v16 = vmax.f32 %v2196_v14, 0.0  ;;  %v2177_v12 = vmul.f32 %v4287_v8, %v2104_v58  ;;  %v2106_v55 = vpop.f32.mrb[7].mxu0 }
 0x239   : > { %v2258_v7 = vmax.f32 %v2210_v5, %v2256_v32 }
 0x23a   : > { %v2228_v11 = vrot.slane %v2212_v16, 1  ;;  %v2197_v0 = vadd.f32 %v4293_v63, %v2177_v12 }
 0x23b   : > { %2274 = vst.msk [vmem:[#allocation2] sm:$0xff] %vm1487_vm4, %v2258_v7  ;;  %v2109_v27 = vpop.f32.mrb[8].mxu0 }
 0x23c   : > { %v2255_v38 = vsel %vm1045_vm1, %v2227_v49, %v2228_v11  ;;  %v2213_v43 = vmax.f32 %v2197_v0, 0.0  ;;  %v2178_v31 = vmul.f32 %v4287_v8, %v2109_v27  ;;  %v2111_v19 = vpop.f32.mrb[9].mxu0 }
 0x23d   : > { %v2259_v57 = vmax.f32 %v2211_v33, %v2255_v38 }
 0x23e   : > { %v2229_v30 = vrot.slane %v2213_v43, 1  ;;  %v2198_v20 = vadd.f32 %v4293_v63, %v2178_v31 }
 0x23f   : > { %2275 = vst.msk [vmem:[#allocation2 + $0x8] sm:$0xff] %vm1487_vm4, %v2259_v57 }
 0x240   : > { %v2254_v15 = vsel %vm1045_vm1, %v2228_v11, %v2229_v30  ;;  %v2214_v17 = vmax.f32 %v2198_v20, 0.0 }
 0x241   : > { %v2114_v61 = vpop.f32.mrb[10].mxu0  ;;  %v2260_v10 = vmax.f32 %v2212_v16, %v2254_v15 }
 0x242   : > { %v2179_v1 = vmul.f32 %v4287_v8, %v2114_v61  ;;  %v2116_v48 = vpop.f32.mrb[11].mxu0  ;;  %v2230_v29 = vrot.slane %v2214_v17, 1 }
 0x243   : > { %2276 = vst.msk [vmem:[#allocation2 + $0x10] sm:$0xff] %vm1487_vm4, %v2260_v10 }
 0x244   : > { %v2199_v36 = vadd.f32 %v4293_v63, %v2179_v1  ;;  %v2253_v42 = vsel %vm1045_vm1, %v2229_v30, %v2230_v29 }
 0x245   : > { %v2261_v23 = vmax.f32 %v2213_v43, %v2253_v42 }
 0x246   : > { %v2215_v41 = vmax.f32 %v2199_v36, 0.0  ;;  %v4328_v9 = vld [vmem:[#allocation2] ss:$2 sm:$0xff] }
 0x247   : > { %2277 = vst.msk [vmem:[#allocation2 + $0x18] sm:$0xff] %vm1487_vm4, %v2261_v23  ;;  %2466 = vrot.lane.b32.xlu0 %v4328_v9, %s3290_s28  ;;  %v2434_v24 = vrot.slane %v4328_v9, 1 }
 0x248   : > { %v2231_v13 = vrot.slane %v2215_v41, 1 }
 0x249   : > { %v2119_v52 = vpop.f32.mrb[12].mxu0 }
 0x24a   : > { %v2180_v28 = vmul.f32 %v4287_v8, %v2119_v52  ;;  %v2121_v35 = vpop.f32.mrb[13].mxu0  ;;  %v2252_v62 = vsel %vm1045_vm1, %v2230_v29, %v2231_v13 }
 0x24b   : > { %v2262_v18 = vmax.f32 %v2214_v17, %v2252_v62 }
 0x24c   : > { %v2200_v4 = vadd.f32 %v4293_v63, %v2180_v28 }
 0x24d   : > { %2278 = vst.msk [vmem:[#allocation2 + $0x20] sm:$0xff] %vm1487_vm4, %v2262_v18 }
 0x24e   : > { %v2216_v47 = vmax.f32 %v2200_v4, 0.0  ;;  %v4340_v33 = vld [vmem:[#allocation2 + $0x10] ss:$2 sm:$0xff] }
 0x24f   : > { %2468 = vrot.lane.b32.xlu1 %v4340_v33, %s3290_s28  ;;  %v2435_v54 = vrot.slane %v4340_v33, 1 }
 0x250   : > { %v2232_v21 = vrot.slane %v2216_v47, 1 }
 0x251   : > { %v2124_v5 = vpop.f32.mrb[14].mxu0  ;;  %v2448_v49 = vsel %vm1045_vm1, %v2434_v24, %v2435_v54 }
 0x252   : > { %v2181_v59 = vmul.f32 %v4287_v8, %v2124_v5  ;;  %v2126_v50 = vpop.f32.mrb[15].mxu0  ;;  %v2251_v44 = vsel %vm1045_vm1, %v2231_v13, %v2232_v21  ;;  %3088 = vmatprep.mubr.msk.f32.mxu1 %vm1487_vm4, %v2448_v49 }
 0x253   : > { %v2263_v2 = vmax.f32 %v2215_v41, %v2251_v44 }
 0x254   : > { %v2201_v53 = vadd.f32 %v4293_v63, %v2181_v59 }
 0x255   : > { %2279 = vst.msk [vmem:[#allocation2 + $0x28] sm:$0xff] %vm1487_vm4, %v2263_v2 }
 0x256   : > { %v2217_v14 = vmax.f32 %v2201_v53, 0.0 }
 0x258   : > { %v2233_v58 = vrot.slane %v2217_v14, 1  ;;  %v2129_v32 = vpop.f32.mrb[16].mxu0 }
 0x259   : > { %v2182_v16 = vmul.f32 %v4287_v8, %v2129_v32  ;;  %v2131_v12 = vpop.f32.mrb[17].mxu0 }
 0x25a   : > { %v2250_v55 = vsel %vm1045_vm1, %v2232_v21, %v2233_v58 }
 0x25b   : > { %v2264_v46 = vmax.f32 %v2216_v47, %v2250_v55  ;;  %v2202_v7 = vadd.f32 %v4293_v63, %v2182_v16 }
 0x25c   : > { %v4362_v56 = vld [vmem:[#allocation2 + $0x20] ss:$2 sm:$0xff] }
 0x25d   : > { %2280 = vst.msk [vmem:[#allocation2 + $0x30] sm:$0xff] %vm1487_vm4, %v2264_v46  ;;  %v2218_v60 = vmax.f32 %v2202_v7, 0.0  ;;  %2470 = vrot.lane.b32.xlu0 %v4362_v56, %s3290_s28 }
 0x25f   : > { %v2234_v11 = vrot.slane %v2218_v60, 1 }
 0x261   : > { %v2249_v0 = vsel %vm1045_vm1, %v2233_v58, %v2234_v11  ;;  %v2134_v27 = vpop.f32.mrb[18].mxu0 }
 0x262   : > { %v2265_v38 = vmax.f32 %v2217_v14, %v2249_v0  ;;  %v2183_v43 = vmul.f32 %v4287_v8, %v2134_v27  ;;  %v2136_v31 = vpop.f32.mrb[19].mxu0 }
 0x264   : > { %2281 = vst.msk [vmem:[#allocation2 + $0x38] sm:$0xff] %vm1487_vm4, %v2265_v38  ;;  %v2203_v19 = vadd.f32 %v4293_v63, %v2183_v43 }
 0x266   : > { %v2219_v22 = vmax.f32 %v2203_v19, 0.0 }
 0x268   : > { %v2235_v57 = vrot.slane %v2219_v22, 1  ;;  %v2139_v40 = vpop.f32.mrb[20].mxu0 }
 0x269   : > { %v2184_v51 = vmul.f32 %v4287_v8, %v2139_v40  ;;  %v2141_v30 = vpop.f32.mrb[21].mxu0 }
 0x26a   : > { %v2248_v20 = vsel %vm1045_vm1, %v2234_v11, %v2235_v57 }
 0x26b   : > { %v2266_v61 = vmax.f32 %v2218_v60, %v2248_v20  ;;  %v2204_v15 = vadd.f32 %v4293_v63, %v2184_v51  ;;  %v4375_v17 = vld [vmem:[#allocation2 + $0x30] ss:$2 sm:$0xff] }
 0x26c   : > { %2472 = vrot.lane.b32.xlu1 %v4375_v17, %s3290_s28 }
 0x26d   : > { %2282 = vst.msk [vmem:[#allocation2 + $0x40] sm:$0xff] %vm1487_vm4, %v2266_v61  ;;  %v2220_v1 = vmax.f32 %v2204_v15, 0.0 }
 0x26f   : > { %v2236_v48 = vrot.slane %v2220_v1, 1  ;;  %v2144_v3 = vpop.f32.mrb[22].mxu0 }
 0x270   : > { %v2185_v10 = vmul.f32 %v4287_v8, %v2144_v3  ;;  %v2146_v26 = vpop.f32.mrb[23].mxu0 }
 0x271   : > { %v2247_v25 = vsel %vm1045_vm1, %v2235_v57, %v2236_v48 }
 0x272   : > { %v2267_v29 = vmax.f32 %v2219_v22, %v2247_v25  ;;  %v2205_v36 = vadd.f32 %v4293_v63, %v2185_v10 }
 0x274   : > { %2283 = vst.msk [vmem:[#allocation2 + $0x48] sm:$0xff] %vm1487_vm4, %v2267_v29  ;;  %v2221_v42 = vmax.f32 %v2205_v36, 0.0 }
 0x276   : > { %v2237_v41 = vrot.slane %v2221_v42, 1 }
 0x277   : > { %v2149_v45 = vpop.f32.mrb[24].mxu0 }
 0x278   : > { %v2246_v23 = vsel %vm1045_vm1, %v2236_v48, %v2237_v41  ;;  %v2186_v13 = vmul.f32 %v4287_v8, %v2149_v45  ;;  %v2151_v52 = vpop.f32.mrb[25].mxu0  ;;  %v2402_v45 = vrot.slane %v4328_v9, 7 }
 0x279   : > { %v2268_v28 = vmax.f32 %v2220_v1, %v2246_v23 }
 0x27a   : > { %v2206_v35 = vadd.f32 %v4293_v63, %v2186_v13  ;;  %v2436_v13 = vrot.slane %v4362_v56, 1 }
 0x27b   : > { %2284 = vst.msk [vmem:[#allocation2 + $0x50] sm:$0xff] %vm1487_vm4, %v2268_v28  ;;  %v4390_v62 = vld [vmem:[#allocation2 + $0x40] ss:$2 sm:$0xff] }
 0x27c   : > { %v2222_v18 = vmax.f32 %v2206_v35, 0.0  ;;  %2474 = vrot.lane.b32.xlu0 %v4390_v62, %s3290_s28  ;;  %v2406_v46 = vrot.slane %v4390_v62, 7  ;;  %v2438_v27 = vrot.slane %v4390_v62, 1 }
 0x27e   : > { %v2238_v4 = vrot.slane %v2222_v18, 1 }
 0x280   : > { %v2245_v47 = vsel %vm1045_vm1, %v2237_v41, %v2238_v4  ;;  %v2302_v41 = vand.u32 31, %v3405_v34 }
 0x281   : > { %v2269_v21 = vmax.f32 %v2221_v42, %v2245_v47  ;;  %v2154_v5 = vpop.f32.mrb[26].mxu0  ;;  %v2437_v47 = vrot.slane %v4375_v17, 1 }
 0x282   : > { %v2187_v59 = vmul.f32 %v4287_v8, %v2154_v5  ;;  %v2156_v50 = vpop.f32.mrb[27].mxu0  ;;  %vm2394_vm11 = vcmp.eq.s32.totalorder %v2302_v41, 0  ;;  %v2837_v41 = vld [vmem:[#allocation3 + $0x1f0] sm:$0xff] }
 0x283   : > { %2285 = vst.msk [vmem:[#allocation2 + $0x58] sm:$0xff] %vm1487_vm4, %v2269_v21  ;;  %v2446_v50 = vsel %vm1045_vm1, %v2436_v13, %v2437_v47 }
 0x284   : > { %v2207_v44 = vadd.f32 %v4293_v63, %v2187_v59 }
 0x285   : > { %v2159_v2 = vpop.f32.mrb[28].mxu0 }
 0x286   : > { %v2223_v53 = vmax.f32 %v2207_v44, 0.0  ;;  %v2188_v49 = vmul.f32 %v4287_v8, %v2159_v2  ;;  %v2161_v14 = vpop.f32.mrb[29].mxu0  ;;  %v4456_v44 = vadd.s32 24, %v3405_v34  ;;  %v2445_v2 = vsel %vm1045_vm1, %v2437_v47, %v2438_v27  ;;  %v4506_v47 = vld [vmem:[%s4628_s4 + $0x2] ss:$0 sm:$0xff] }
 0x288   : > { %v2239_v58 = vrot.slane %v2223_v53, 1  ;;  %v2208_v32 = vadd.f32 %v4293_v63, %v2188_v49 }
 0x289   : > { %v2164_v16 = vpop.f32.mrb[30].mxu0 }
 0x28a   : > { %v2244_v12 = vsel %vm1045_vm1, %v2238_v4, %v2239_v58  ;;  %v2224_v55 = vmax.f32 %v2208_v32, 0.0  ;;  %v2189_v7 = vmul.f32 %v4287_v8, %v2164_v16  ;;  %v2166_v60 = vpop.f32.mrb[31].mxu0  ;;  %v2295_v11 = vld [vmem:[#allocation2 + $0x50] ss:$2 sm:$0xff]  ;;  %v2403_v4 = vrot.slane %v4340_v33, 7 }
 0x28b   : > { %v2270_v0 = vmax.f32 %v2222_v18, %v2244_v12  ;;  %2476 = vrot.lane.b32.xlu1 %v2295_v11, %s3290_s28  ;;  %v2407_v38 = vrot.slane %v2295_v11, 7  ;;  %v2439_v43 = vrot.slane %v2295_v11, 1  ;;  %v2447_v18 = vsel %vm1045_vm1, %v2435_v54, %v2436_v13  ;;  %v4499_v13 = vld [vmem:[%s4627_s3 + $0x2] ss:$0 sm:$0xff] }
 0x28c   : > { %v2240_v31 = vrot.slane %v2224_v55, 1  ;;  %v2209_v19 = vadd.f32 %v4293_v63, %v2189_v7  ;;  %v2416_v5 = vsel %vm916_vm0, %v2402_v45, %v2403_v4  ;;  %v2323_v54 = vand.u32 31, %v4456_v44 }
 0x28d   : > { %2286 = vst.msk [vmem:[#allocation2 + $0x60] sm:$0xff] %vm1487_vm4, %v2270_v0  ;;  %v2444_v22 = vsel %vm1045_vm1, %v2438_v27, %v2439_v43  ;;  %v4415_v8 = vsel %vm916_vm0, %v2406_v46, %v2407_v38  ;;  %v2404_v33 = vrot.slane %v4362_v56, 7  ;;  %v2405_v32 = vrot.slane %v4375_v17, 7 }
 0x28e   : > { %v2243_v57 = vsel %vm1045_vm1, %v2239_v58, %v2240_v31  ;;  %v2225_v40 = vmax.f32 %v2209_v19, 0.0  ;;  %vm2429_vm12 = vcmp.eq.s32.totalorder %v2323_v54, 31 }
 0x28f   : > { %v2271_v51 = vmax.f32 %v2223_v53, %v2243_v57  ;;  %v2415_v49 = vsel %vm916_vm0, %v2403_v4, %v2404_v33  ;;  %v2453_v58 = vsel %vm2429_vm12, 0.0, %v2445_v2  ;;  %v2414_v56 = vsel %vm916_vm0, %v2404_v33, %v2405_v32  ;;  %v2823_v57 = vld [vmem:[#allocation3 + $0x180] sm:$0xff] }
 0x290   : > { %v2241_v30 = vrot.slane %v2225_v40, 1  ;;  %v2413_v60 = vsel %vm916_vm0, %v2405_v32, %v2406_v46 }
 0x291   : > { %2287 = vst.msk [vmem:[#allocation2 + $0x68] sm:$0xff] %vm1487_vm4, %v2271_v51 }
 0x292   : > { %v2242_v63 = vsel %vm1045_vm1, %v2240_v31, %v2241_v30  ;;  %v2257_v20 = vsel %vm1045_vm1, %v2241_v30, %v4303_v37  ;;  %v2826_v30 = vld [vmem:[#allocation3 + $0x198] sm:$0xff] }
 0x293   : > { %v2272_v61 = vmax.f32 %v2224_v55, %v2242_v63  ;;  %v2273_v15 = vmax.f32 %v2225_v40, %v2257_v20  ;;  %v440_v55 = vadd.s32 32, %v3405_v34  ;;  %v2824_v40 = vld [vmem:[#allocation3 + $0x188] sm:$0xff] }
 0x294   : > { %v3179_v51 = vpack.c.bf16 %v2824_v40, %v2823_v57  ;;  %v2828_v63 = vld [vmem:[#allocation3 + $0x1a8] sm:$0xff] }
 0x295   : > { %2288 = vst.msk [vmem:[#allocation2 + $0x70] sm:$0xff] %vm1487_vm4, %v2272_v61  ;;  %2289 = vst.msk [vmem:[#allocation2 + $0x78] sm:$0xff] %vm1487_vm4, %v2273_v15  ;;  %v2330_v7 = vand.u32 31, %v440_v55  ;;  %v2829_v61 = vld [vmem:[#allocation3 + $0x1b0] sm:$0xff]  ;;  %v2830_v15 = vld [vmem:[#allocation3 + $0x1b8] sm:$0xff] }
 0x296   : > { %v2846_v55 = vld [vmem:[#allocation3 + $0x238] sm:$0xff] }
 0x297   : > { %vm2398_vm13 = vcmp.eq.s32.totalorder %v2330_v7, 0 }
 0x298   : > { %v2296_v1 = vld [vmem:[#allocation2 + $0x60] ss:$2 sm:$0xff]  ;;  %v2422_v17 = vsel %vm2398_vm13, 0.0, %v2413_v60 }
 0x299   : > { %2478 = vrot.lane.b32.xlu0 %v2296_v1, %s3290_s28  ;;  %v2408_v48 = vrot.slane %v2296_v1, 7  ;;  %v2440_v3 = vrot.slane %v2296_v1, 1  ;;  %v3188_v1 = vpack.c.bf16 %v2830_v15, %v2829_v61 }
 0x29b   : > { %v2443_v10 = vsel %vm1045_vm1, %v2439_v43, %v2440_v3  ;;  %v2411_v26 = vsel %vm916_vm0, %v2407_v38, %v2408_v48  ;;  %v2351_v43 = vand.u32 31, %v4218_v6  ;;  %v2825_v6 = vld [vmem:[#allocation3 + $0x190] sm:$0xff] }
 0x29c   : > { %v2297_v25 = vld [vmem:[#allocation2 + $0x70] ss:$2 sm:$0xff]  ;;  %v3182_v9 = vpack.c.bf16 %v2826_v30, %v2825_v6 }
 0x29d   : > { %2480 = vrot.lane.b32.xlu1 %v2297_v25, %s3290_s28  ;;  %v2409_v37 = vrot.slane %v2297_v25, 7  ;;  %v2441_v29 = vrot.slane %v2297_v25, 1  ;;  %vm2433_vm14 = vcmp.eq.s32.totalorder %v2351_v43, 31  ;;  %v2834_v25 = vld [vmem:[#allocation3 + $0x1d8] sm:$0xff] }
 0x29f   : > { %v2442_v36 = vsel %vm1045_vm1, %v2440_v3, %v2441_v29  ;;  %v2410_v42 = vsel %vm916_vm0, %v2408_v48, %v2409_v37  ;;  %v2417_v23 = vsel %vm916_vm0, %v2409_v37, %v2402_v45  ;;  %v2449_v62 = vsel %vm1045_vm1, %v2441_v29, %v2434_v24  ;;  %v2827_v24 = vld [vmem:[#allocation3 + $0x1a0] sm:$0xff]  ;;  %v2832_v3 = vld [vmem:[#allocation3 + $0x1c8] sm:$0xff]  ;;  %v2838_v45 = vld [vmem:[#allocation3 + $0x1f8] sm:$0xff] }
 0x2a0   : > { %v2418_v28 = vsel %vm2394_vm11, 0.0, %v2417_v23  ;;  %v2457_v19 = vsel %vm2433_vm14, 0.0, %v2449_v62  ;;  %v3185_v20 = vpack.c.bf16 %v2828_v63, %v2827_v24  ;;  %v2831_v48 = vld [vmem:[#allocation3 + $0x1c0] sm:$0xff] }
 0x2a1   : > { %v2835_v29 = vld [vmem:[#allocation3 + $0x1e0] sm:$0xff] }
 0x2b9   : > { %v2467_v52 = vpop.permute.xlu0 %2466 }
 0x2ba   : > { %v2490_v35 = vsel %vm1487_vm4, %v2418_v28, %v2467_v52  ;;  %v3200_v28 = vpack.c.bf16 %v2838_v45, %v2837_v41 }
 0x2bb   : > { %2612 = vmatmul.mubr.f32.vlgmr.msra.gmra.mrb[0].mxu1 %v2490_v35  ;;  %v2839_v35 = vld [vmem:[#allocation3 + $0x200] sm:$0xff] }
 0x2bc   : > { %3089 = vmatprep.mubr.msk.f32.mxu1 %vm1487_vm4, %v2447_v18  ;;  %3180 = vmatpush1.bf16.msra.mxu1 %v3179_v51  ;;  %v2840_v18 = vld [vmem:[#allocation3 + $0x208] sm:$0xff] }
 0x2bd   : > { %3181 = vmatprep.subr.bf16.mxu1 %v3291_v39 }
 0x2c0   : > { %3183 = vmatpush1.bf16.msra.mxu1 %v3182_v9 }
 0x2c1   : > { %v2469_v21 = vpop.permute.xlu1 %2468  ;;  %3184 = vmatprep.subr.bf16.mxu1 %v3291_v39 }
 0x2c2   : > { %v2491_v59 = vsel %vm1487_vm4, %v2416_v5, %v2469_v21  ;;  %v3203_v21 = vpack.c.bf16 %v2840_v18, %v2839_v35  ;;  %v2841_v5 = vld [vmem:[#allocation3 + $0x210] sm:$0xff] }
 0x2c3   : > { %2617 = vmatmul.mubr.f32.gmra.mrb[2].mxu1 %v2491_v59  ;;  %v2842_v59 = vld [vmem:[#allocation3 + $0x218] sm:$0xff] }
 0x2c4   : > { %3090 = vmatprep.mubr.msk.f32.mxu1 %vm1487_vm4, %v2446_v50  ;;  %3186 = vmatpush1.bf16.msra.mxu1 %v3185_v20 }
 0x2c5   : > { %3187 = vmatprep.subr.bf16.mxu1 %v3291_v39 }
 0x2c8   : > { %3189 = vmatpush1.bf16.msra.mxu1 %v3188_v1 }
 0x2c9   : > { %3190 = vmatprep.subr.bf16.mxu1 %v3291_v39 }
 0x2cf   : > { %v2471_v53 = vpop.permute.xlu0 %2470 }
 0x2d0   : > { %v2492_v14 = vsel %vm1487_vm4, %v2415_v49, %v2471_v53  ;;  %v3206_v53 = vpack.c.bf16 %v2842_v59, %v2841_v5  ;;  %v2843_v49 = vld [vmem:[#allocation3 + $0x220] sm:$0xff] }
 0x2d1   : > { %2622 = vmatmul.mubr.f32.gmra.mrb[4].mxu1 %v2492_v14  ;;  %v2844_v14 = vld [vmem:[#allocation3 + $0x228] sm:$0xff] }
 0x2d2   : > { %3091 = vmatprep.mubr.msk.f32.mxu1 %vm1487_vm4, %v2453_v58 }
 0x2de   : > { %v2473_v16 = vpop.permute.xlu1 %2472 }
 0x2df   : > { %v2493_v12 = vsel %vm1487_vm4, %v2414_v56, %v2473_v16  ;;  %v3209_v56 = vpack.c.bf16 %v2844_v14, %v2843_v49 }
 0x2e0   : > { %2627 = vmatmul.mubr.f32.gmra.mrb[6].mxu1 %v2493_v12  ;;  %v2845_v12 = vld [vmem:[#allocation3 + $0x230] sm:$0xff] }
 0x2e1   : > { %3092 = vmatprep.mubr.msk.f32.mxu1 %vm1487_vm4, %v2444_v22 }
 0x2ee   : > { %v2475_v11 = vpop.permute.xlu0 %2474 }
 0x2ef   : > { %v2494_v0 = vsel %vm1487_vm4, %v2422_v17, %v2475_v11  ;;  %v3212_v17 = vpack.c.bf16 %v2846_v55, %v2845_v12 }
 0x2f0   : > { %2632 = vmatmul.mubr.f32.gmra.mrb[8].mxu1 %v2494_v0 }
 0x2f1   : > { %3093 = vmatprep.mubr.msk.f32.mxu1 %vm1487_vm4, %v2443_v10  ;;  %v3191_v10 = vpack.c.bf16 %v2832_v3, %v2831_v48 }
 0x2f3   : > { %3192 = vmatpush1.bf16.msra.mxu1 %v3191_v10 }
 0x2f4   : > { %3193 = vmatprep.subr.bf16.mxu1 %v3291_v39 }
 0x2fd   : > { %v2477_v27 = vpop.permute.xlu1 %2476 }
 0x2fe   : > { %v2495_v38 = vsel %vm1487_vm4, %v4415_v8, %v2477_v27 }
 0x2ff   : > { %2637 = vmatmul.mubr.f32.gmra.mrb[10].mxu1 %v2495_v38 }
 0x300   : > { %3094 = vmatprep.mubr.msk.f32.mxu1 %vm1487_vm4, %v2442_v36  ;;  %v2836_v36 = vld [vmem:[#allocation3 + $0x1e8] sm:$0xff] }
 0x30b   : > { %v2479_v46 = vpop.permute.xlu0 %2478 }
 0x30c   : > { %v2496_v31 = vsel %vm1487_vm4, %v2411_v26, %v2479_v46  ;;  %v2833_v26 = vld [vmem:[#allocation3 + $0x1d0] sm:$0xff] }
 0x30d   : > { %2642 = vmatmul.mubr.f32.gmra.mrb[12].mxu1 %v2496_v31  ;;  %v3194_v37 = vpack.c.bf16 %v2834_v25, %v2833_v26 }
 0x30e   : > { %3095 = vmatprep.mubr.msk.f32.mxu1 %vm1487_vm4, %v2457_v19 }
 0x30f   : > { %v2481_v22 = vpop.permute.xlu1 %2480  ;;  %3195 = vmatpush1.bf16.msra.mxu1 %v3194_v37 }
 0x310   : > { %v2497_v8 = vsel %vm1487_vm4, %v2410_v42, %v2481_v22  ;;  %v3197_v42 = vpack.c.bf16 %v2836_v36, %v2835_v29  ;;  %3196 = vmatprep.subr.bf16.mxu1 %v3291_v39 }
 0x311   : > { %2647 = vmatmul.mubr.f32.gmra.mrb[14].mxu1 %v2497_v8 }
 0x313   : > { %3198 = vmatpush1.bf16.msra.mxu1 %v3197_v42 }
 0x314   : > { %3199 = vmatprep.subr.bf16.mxu1 %v3291_v39 }
 0x317   : > { %3201 = vmatpush1.bf16.msra.mxu1 %v3200_v28 }
 0x318   : > { %3202 = vmatprep.subr.bf16.mxu1 %v3291_v39 }
 0x31b   : > { %3204 = vmatpush1.bf16.msra.mxu1 %v3203_v21 }
 0x31c   : > { %3205 = vmatprep.subr.bf16.mxu1 %v3291_v39 }
 0x31f   : > { %3207 = vmatpush1.bf16.msra.mxu1 %v3206_v53 }
 0x320   : > { %3208 = vmatprep.subr.bf16.mxu1 %v3291_v39 }
 0x323   : > { %3210 = vmatpush1.bf16.msra.mxu1 %v3209_v56 }
 0x324   : > { %3211 = vmatprep.subr.bf16.mxu1 %v3291_v39 }
 0x327   : > { %3213 = vmatpush1.bf16.msra.mxu1 %v3212_v17 }
 0x38e   : > { %v2613_v23 = vpop.f32.mrb[0].mxu1 }
 0x38f   : > { %v2615_v52 = vpop.f32.mrb[1].mxu1  ;;  %v2658_v4 = vmul.f32 %v4499_v13, %v2613_v23 }
 0x391   : > { %v2670_v50 = vadd.f32 %v4506_v47, %v2658_v4 }
 0x393   : > { %v2678_v58 = vmax.f32 %v2670_v50, 0.0 }
 0x395   : > { %v4514_v7 = vrot.slane %v2678_v58, 1 }
 0x396   : > { %v2618_v54 = vpop.f32.mrb[2].mxu1 }
 0x397   : > { %v2659_v33 = vmul.f32 %v4499_v13, %v2618_v54  ;;  %v2620_v2 = vpop.f32.mrb[3].mxu1 }
 0x399   : > { %v2671_v32 = vadd.f32 %v4506_v47, %v2659_v33 }
 0x39b   : > { %v2679_v16 = vmax.f32 %v2671_v32, 0.0 }
 0x39d   : > { %v2687_v60 = vrot.slane %v2679_v16, 1 }
 0x39f   : > { %v2700_v11 = vsel %vm1045_vm1, %v4514_v7, %v2687_v60 }
 0x3a0   : > { %v2702_v0 = vmax.f32 %v2678_v58, %v2700_v11 }
 0x3a2   : > { %2710 = vst.msk [vmem:[#allocation2] sm:$0xff] %vm1487_vm4, %v2702_v0 }
 0x3a4   : > { %v2623_v27 = vpop.f32.mrb[4].mxu1 }
 0x3a5   : > { %v2660_v38 = vmul.f32 %v4499_v13, %v2623_v27  ;;  %v2625_v43 = vpop.f32.mrb[5].mxu1  ;;  %v437_v27 = vadd.s32 8, %v3405_v34 }
 0x3a7   : > { %v2672_v62 = vadd.f32 %v4506_v47, %v2660_v38  ;;  %v2726_v38 = vand.u32 15, %v3405_v34 }
 0x3a9   : > { %v2680_v46 = vmax.f32 %v2672_v62, 0.0  ;;  %vm2770_vm15 = vcmp.eq.s32.totalorder %v2726_v38, 0 }
 0x3ab   : > { %v2688_v31 = vrot.slane %v2680_v46, 1 }
 0x3ad   : > { %v2699_v19 = vsel %vm1045_vm1, %v2687_v60, %v2688_v31 }
 0x3ae   : > { %v2703_v22 = vmax.f32 %v2679_v16, %v2699_v19 }
 0x3b0   : > { %2711 = vst.msk [vmem:[#allocation2 + $0x8] sm:$0xff] %vm1487_vm4, %v2703_v22 }
 0x3b3   : > { %v2628_v8 = vpop.f32.mrb[6].mxu1 }
 0x3b4   : > { %v2661_v39 = vmul.f32 %v4499_v13, %v2628_v8  ;;  %v2630_v57 = vpop.f32.mrb[7].mxu1 }
 0x3b6   : > { %v2673_v40 = vadd.f32 %v4506_v47, %v2661_v39 }
 0x3b7   : > { %v4528_v51 = vld [vmem:[#allocation2] ss:$2 sm:$0xff] }
 0x3b8   : > { %v2681_v6 = vmax.f32 %v2673_v40, 0.0  ;;  %2806 = vrot.lane.b32.xlu0 %v4528_v51, %s3290_s28  ;;  %v2790_v41 = vrot.slane %v4528_v51, 1  ;;  %v2774_v62 = vrot.slane %v4528_v51, 7 }
 0x3ba   : > { %v2689_v30 = vrot.slane %v2681_v6, 1 }
 0x3bc   : > { %v2698_v9 = vsel %vm1045_vm1, %v2688_v31, %v2689_v30 }
 0x3bd   : > { %v2704_v24 = vmax.f32 %v2680_v46, %v2698_v9  ;;  %v2733_v46 = vand.u32 15, %v437_v27 }
 0x3bf   : > { %2712 = vst.msk [vmem:[#allocation2 + $0x10] sm:$0xff] %vm1487_vm4, %v2704_v24  ;;  %vm2787_vm2 = vcmp.eq.s32.totalorder %v2733_v46, 15  ;;  %v438_v24 = vadd.s32 16, %v3405_v34 }
 0x3c3   : > { %v2633_v63 = vpop.f32.mrb[8].mxu1 }
 0x3c4   : > { %v2662_v20 = vmul.f32 %v4499_v13, %v2633_v63  ;;  %v2635_v61 = vpop.f32.mrb[9].mxu1  ;;  %v2740_v63 = vand.u32 15, %v438_v24 }
 0x3c6   : > { %v2674_v15 = vadd.f32 %v4506_v47, %v2662_v20  ;;  %v2747_v20 = vand.u32 15, %v4456_v44  ;;  %vm2772_vm3 = vcmp.eq.s32.totalorder %v2740_v63, 0  ;;  %v3102_v44 = vld [vmem:[%s4627_s3 + $0x3] ss:$0 sm:$0xff] }
 0x3c8   : > { %v2682_v1 = vmax.f32 %v2674_v15, 0.0  ;;  %vm2789_vm5 = vcmp.eq.s32.totalorder %v2747_v20, 15 }
 0x3ca   : > { %v2690_v48 = vrot.slane %v2682_v1, 1 }
 0x3cc   : > { %v2697_v3 = vsel %vm1045_vm1, %v2689_v30, %v2690_v48 }
 0x3cd   : > { %v2705_v10 = vmax.f32 %v2681_v6, %v2697_v3 }
 0x3cf   : > { %2713 = vst.msk [vmem:[#allocation2 + $0x18] sm:$0xff] %vm1487_vm4, %v2705_v10 }
 0x3d2   : > { %v2638_v26 = vpop.f32.mrb[10].mxu1 }
 0x3d3   : > { %v2663_v25 = vmul.f32 %v4499_v13, %v2638_v26  ;;  %v2640_v37 = vpop.f32.mrb[11].mxu1 }
 0x3d5   : > { %v2675_v29 = vadd.f32 %v4506_v47, %v2663_v25 }
 0x3d6   : > { %v4542_v36 = vld [vmem:[#allocation2 + $0x10] ss:$2 sm:$0xff] }
 0x3d7   : > { %v2683_v42 = vmax.f32 %v2675_v29, 0.0  ;;  %2808 = vrot.lane.b32.xlu1 %v4542_v36, %s3290_s28  ;;  %v2791_v45 = vrot.slane %v4542_v36, 1  ;;  %v2775_v40 = vrot.slane %v4542_v36, 7  ;;  %v3103_v36 = vld [vmem:[%s4628_s4 + $0x3] ss:$0 sm:$0xff] }
 0x3d9   : > { %v2691_v23 = vrot.slane %v2683_v42, 1  ;;  %v2796_v52 = vsel %vm1045_vm1, %v2790_v41, %v2791_v45  ;;  %v2780_v51 = vsel %vm916_vm0, %v2774_v62, %v2775_v40 }
 0x3da   : > { %3098 = vmatprep.mubr.msk.f32.mxu1 %vm1487_vm4, %v2796_v52 }
 0x3db   : > { %v2696_v28 = vsel %vm1045_vm1, %v2690_v48, %v2691_v23 }
 0x3dc   : > { %v2706_v35 = vmax.f32 %v2682_v1, %v2696_v28 }
 0x3de   : > { %2714 = vst.msk [vmem:[#allocation2 + $0x20] sm:$0xff] %vm1487_vm4, %v2706_v35 }
 0x3e0   : > { %v2643_v18 = vpop.f32.mrb[12].mxu1 }
 0x3e1   : > { %v2664_v4 = vmul.f32 %v4499_v13, %v2643_v18  ;;  %v2645_v21 = vpop.f32.mrb[13].mxu1 }
 0x3e3   : > { %v2676_v5 = vadd.f32 %v4506_v47, %v2664_v4 }
 0x3e4   : > { %v2648_v59 = vpop.f32.mrb[14].mxu1 }
 0x3e5   : > { %v2684_v50 = vmax.f32 %v2676_v5, 0.0  ;;  %v2665_v54 = vmul.f32 %v4499_v13, %v2648_v59  ;;  %v2650_v33 = vpop.f32.mrb[15].mxu1 }
 0x3e7   : > { %v2692_v2 = vrot.slane %v2684_v50, 1  ;;  %v2677_v53 = vadd.f32 %v4506_v47, %v2665_v54 }
 0x3e9   : > { %v2695_v49 = vsel %vm1045_vm1, %v2691_v23, %v2692_v2  ;;  %v2685_v14 = vmax.f32 %v2677_v53, 0.0 }
 0x3ea   : > { %v2707_v58 = vmax.f32 %v2683_v42, %v2695_v49 }
 0x3eb   : > { %v2693_v32 = vrot.slane %v2685_v14, 1 }
 0x3ec   : > { %2715 = vst.msk [vmem:[#allocation2 + $0x28] sm:$0xff] %vm1487_vm4, %v2707_v58 }
 0x3ed   : > { %v2694_v16 = vsel %vm1045_vm1, %v2692_v2, %v2693_v32  ;;  %v2701_v56 = vsel %vm1045_vm1, %v2693_v32, %v4514_v7 }
 0x3ee   : > { %v2708_v13 = vmax.f32 %v2684_v50, %v2694_v16  ;;  %v2709_v12 = vmax.f32 %v2685_v14, %v2701_v56 }
 0x3f0   : > { %2716 = vst.msk [vmem:[#allocation2 + $0x30] sm:$0xff] %vm1487_vm4, %v2708_v13  ;;  %2717 = vst.msk [vmem:[#allocation2 + $0x38] sm:$0xff] %vm1487_vm4, %v2709_v12 }
 0x3f3   : > { %v2720_v47 = vld [vmem:[#allocation2 + $0x20] ss:$2 sm:$0xff] }
 0x3f4   : > { %2810 = vrot.lane.b32.xlu0 %v2720_v47, %s3290_s28  ;;  %v2776_v60 = vrot.slane %v2720_v47, 7  ;;  %v2792_v43 = vrot.slane %v2720_v47, 1 }
 0x3f6   : > { %v2795_v19 = vsel %vm1045_vm1, %v2791_v45, %v2792_v43  ;;  %v2779_v61 = vsel %vm916_vm0, %v2775_v40, %v2776_v60 }
 0x3f7   : > { %v2721_v55 = vld [vmem:[#allocation2 + $0x30] ss:$2 sm:$0xff]  ;;  %v2799_v57 = vsel %vm2787_vm2, 0.0, %v2795_v19  ;;  %v2784_v1 = vsel %vm2772_vm3, 0.0, %v2779_v61 }
 0x3f8   : > { %2812 = vrot.lane.b32.xlu1 %v2721_v55, %s3290_s28  ;;  %v2777_v11 = vrot.slane %v2721_v55, 7  ;;  %v2793_v17 = vrot.slane %v2721_v55, 1  ;;  %s3063_s28 = sshll.u32 %s3328_s19, 1 }
 0x3f9   : > { %p238_p3 = scmp.lt.s32.totalorder %s3063_s28, 3 }
 0x3fa   : > { %v2797_v0 = vsel %vm1045_vm1, %v2793_v17, %v2790_v41  ;;  %v2778_v7 = vsel %vm916_vm0, %v2776_v60, %v2777_v11  ;;  %v2781_v31 = vsel %vm916_vm0, %v2777_v11, %v2774_v62  ;;  %v2794_v9 = vsel %vm1045_vm1, %v2792_v43, %v2793_v17 }
 0x3fb   : > { %v2782_v22 = vsel %vm2770_vm15, 0.0, %v2781_v31  ;;  %v2801_v3 = vsel %vm2789_vm5, 0.0, %v2797_v0  ;;  %s4648_s28 = smov (!%p238_p3, %s3063_s28), 3 }
 0x3fc   : > { %s3064_s19 = sshll.u32 %s4648_s28, 3 }
 0x3fd   : > { %s241_s6 = scalar_lea.vmem %s4629_s5, %s3064_s19 }
 0x42a   : > { %v2807_v8 = vpop.permute.xlu0 %2806 }
 0x42b   : > { %v2818_v39 = vsel %vm1487_vm4, %v2782_v22, %v2807_v8 }
 0x42c   : > { %2924 = vmatmul.mubr.f32.vlgmr.msra.gmra.mrb[16].mxu1 %v2818_v39 }
 0x42d   : > { %3099 = vmatprep.mubr.msk.f32.mxu1 %vm1487_vm4, %v2799_v57 }
 0x449   : > { %v2809_v6 = vpop.permute.xlu1 %2808 }
 0x44a   : > { %v2819_v30 = vsel %vm1487_vm4, %v2780_v51, %v2809_v6 }
 0x44b   : > { %2929 = vmatmul.mubr.f32.gmra.mrb[18].mxu1 %v2819_v30 }
 0x44c   : > { %3100 = vmatprep.mubr.msk.f32.mxu1 %vm1487_vm4, %v2794_v9 }
 0x466   : > { %v2811_v15 = vpop.permute.xlu0 %2810 }
 0x467   : > { %v2820_v48 = vsel %vm1487_vm4, %v2784_v1, %v2811_v15 }
 0x468   : > { %2934 = vmatmul.mubr.f32.gmra.mrb[20].mxu1 %v2820_v48 }
 0x469   : > { %3101 = vmatprep.mubr.msk.f32.mxu1 %vm1487_vm4, %v2801_v3 }
 0x46a   : > { %v2813_v10 = vpop.permute.xlu1 %2812 }
 0x46b   : > { %v2821_v26 = vsel %vm1487_vm4, %v2778_v7, %v2813_v10 }
 0x46c   : > { %2939 = vmatmul.mubr.f32.gmra.mrb[22].mxu1 %v2821_v26 }
 0x4ff   : > { %v2925_v25 = vpop.f32.mrb[16].mxu1 }
 0x500   : > { %v2927_v37 = vpop.f32.mrb[17].mxu1  ;;  %v2950_v29 = vmul.f32 %v3102_v44, %v2925_v25 }
 0x502   : > { %v2958_v42 = vadd.f32 %v3103_v36, %v2950_v29 }
 0x504   : > { %v2962_v52 = vmax.f32 %v2958_v42, 0.0 }
 0x506   : > { %v2966_v18 = vrot.slane %v2962_v52, 1 }
 0x51e   : > { %v2930_v41 = vpop.f32.mrb[18].mxu1 }
 0x51f   : > { %v2951_v45 = vmul.f32 %v3102_v44, %v2930_v41  ;;  %v2932_v23 = vpop.f32.mrb[19].mxu1 }
 0x521   : > { %v2959_v28 = vadd.f32 %v3103_v36, %v2951_v45 }
 0x523   : > { %v2963_v35 = vmax.f32 %v2959_v28, 0.0 }
 0x525   : > { %v2967_v4 = vrot.slane %v2963_v35, 1 }
 0x527   : > { %v2972_v21 = vsel %vm1045_vm1, %v2966_v18, %v2967_v4 }
 0x528   : > { %v2974_v5 = vmax.f32 %v2962_v52, %v2972_v21 }
 0x52a   : > { %2978 = vst.msk [vmem:[#allocation2] sm:$0xff] %vm1487_vm4, %v2974_v5 }
 0x53b   : > { %v2935_v59 = vpop.f32.mrb[20].mxu1 }
 0x53c   : > { %v2952_v50 = vmul.f32 %v3102_v44, %v2935_v59  ;;  %v2937_v54 = vpop.f32.mrb[21].mxu1 }
 0x53e   : > { %v2960_v33 = vadd.f32 %v3103_v36, %v2952_v50 }
 0x53f   : > { %v2940_v2 = vpop.f32.mrb[22].mxu1 }
 0x540   : > { %v2964_v53 = vmax.f32 %v2960_v33, 0.0  ;;  %v2953_v49 = vmul.f32 %v3102_v44, %v2940_v2  ;;  %v2942_v14 = vpop.f32.mrb[23].mxu1 }
 0x542   : > { %v2968_v58 = vrot.slane %v2964_v53, 1  ;;  %v2961_v32 = vadd.f32 %v3103_v36, %v2953_v49 }
 0x544   : > { %v2971_v16 = vsel %vm1045_vm1, %v2967_v4, %v2968_v58  ;;  %v2965_v56 = vmax.f32 %v2961_v32, 0.0 }
 0x545   : > { %v2975_v13 = vmax.f32 %v2963_v35, %v2971_v16 }
 0x546   : > { %v2969_v12 = vrot.slane %v2965_v56, 1 }
 0x547   : > { %2979 = vst.msk [vmem:[#allocation2 + $0x8] sm:$0xff] %vm1487_vm4, %v2975_v13 }
 0x548   : > { %v2970_v47 = vsel %vm1045_vm1, %v2968_v58, %v2969_v12  ;;  %v2973_v55 = vsel %vm1045_vm1, %v2969_v12, %v2966_v18 }
 0x549   : > { %v2976_v60 = vmax.f32 %v2964_v53, %v2970_v47  ;;  %v2977_v11 = vmax.f32 %v2965_v56, %v2973_v55 }
 0x54b   : > { %2980 = vst.msk [vmem:[#allocation2 + $0x10] sm:$0xff] %vm1487_vm4, %v2976_v60  ;;  %2981 = vst.msk [vmem:[#allocation2 + $0x18] sm:$0xff] %vm1487_vm4, %v2977_v11 }
 0x54e   : > { %v2982_v17 = vld [vmem:[#allocation2] ss:$2 sm:$0xff] }
 0x54f   : > { %2984 = vst.msk [vmem:[%s241_s6] sm:$0xff] %vm1487_vm4, %v2982_v17 }
 0x552   : > { %v2983_v0 = vld [vmem:[#allocation2 + $0x10] ss:$2 sm:$0xff] }
 0x553   : > { %2985 = vst.msk [vmem:[%s241_s6 + $0x8] sm:$0xff] %vm1487_vm4, %v2983_v0 }
 0x554 PF: > { %s16_s18 = sadd.s32 1, %s3284_s18  }
 0x555   : > { %p13_p5 = scmp.ge.s32.totalorder %s16_s18, 4  }
 0x557   :  { %15 = sbr.rel (!%p13_p5) target bundleno = 1 (0x1), region = 92 }
 0x55e   :  { %3008 = vsyncpa [#allocation4], 1 }
 0x55f   :  { %3010 = vsyncpa [#allocation4 + $0x1], 1 }

</bundles_post_ra>
